<compile_context>
chip_gen: v6e
topology: v6e:2x2x1
jax: 0.10.0
libtpu: 0.0.40
codegen_flags: <defaults>
</compile_context>

<pallas_src>
import functools

import jax
import jax.numpy as jnp
from jax import lax
from jax.experimental import pallas as pl
from jax.experimental.pallas import tpu as pltpu


def _round_up(x, m):
    return (x + m - 1) // m * m


def _block_kernel(x_ref, amat_ref, gamma_ref, beta_ref, scale_ref, shift_ref,
                  w_ref, cb_ref, o_ref, pad_ref, *,
                  H, W, Wp, CH, sub, eps, use_norm, has_film):
    """Fused GroupNorm + FiLM + SiLU + 3x3 conv for one image.

    x_ref     : (1, H*W, C)     channels-last, spatially flattened
    amat_ref  : (C, C)          group-averaging matrix (1/(HW*cg) within a group)
    gamma/beta: (1, C)          GroupNorm affine
    scale/shift:(1, 1, C)       FiLM conditioning (unused refs when has_film=False)
    w_ref     : (9, C, Cout)    conv weight, tap-major (dy*3+dx, Cin, Cout)
    cb_ref    : (1, Cout)       conv bias
    o_ref     : (1, H*W, Cout)  valid (junk-free) output, row-major
    pad_ref   : (P, C) VMEM     zero-padded, row-flattened activation slab
                                (conv_dtype; Wp columns per padded row)
    """
    C = x_ref.shape[-1]
    P = pad_ref.shape[0]
    w_aligned = (W % 8 == 0)

    # ---- GroupNorm statistics: cheap row-sums (XLU) + tiny averaging matmul.
    if use_norm:
        x = x_ref[0].astype(jnp.float32)                       # (HW, C)
        s1 = jnp.sum(x, axis=0, keepdims=True)                  # (1, C)
        s2 = jnp.sum(x * x, axis=0, keepdims=True)              # (1, C)
        mean = jnp.dot(s1, amat_ref[...], preferred_element_type=jnp.float32)
        msq = jnp.dot(s2, amat_ref[...], preferred_element_type=jnp.float32)
        # Single-pass variance in f32 (eps protects the rsqrt).
        var = msq - mean * mean
        rstd = lax.rsqrt(var + eps)
        a_ch = rstd * gamma_ref[...]                             # (1, C)
        b_ch = beta_ref[...] - mean * a_ch                       # (1, C)
    else:
        a_ch = jnp.ones((1, C), jnp.float32)
        b_ch = jnp.zeros((1, C), jnp.float32)

    # ---- Fold FiLM into the same per-channel affine (compiled out if unused).
    if has_film:
        sc = scale_ref[0].astype(jnp.float32) + 1.0
        sh = shift_ref[0].astype(jnp.float32)
        a_ch = a_ch * sc
        b_ch = b_ch * sc + sh

    # Hoisted sublane broadcast of the per-channel affine (not re-done per row).
    a_coef = jnp.broadcast_to(a_ch, (W, C))
    b_coef = jnp.broadcast_to(b_ch, (W, C))

    # ---- Zero only the halo (top padded row + bottom halo / overflow rows).
    pad_ref[pl.ds(0, Wp), :] = jnp.zeros((Wp, C), pad_ref.dtype)
    tail = P - (H + 1) * Wp
    pad_ref[pl.ds((H + 1) * Wp, tail), :] = jnp.zeros((tail, C), pad_ref.dtype)

    # ---- Interior rows: affine + SiLU per row, stored as one aligned padded row.
    z_left = jnp.zeros((1, C), pad_ref.dtype)
    z_right = jnp.zeros((Wp - W - 1, C), pad_ref.dtype)

    def build_row(r, carry):
        src = r * W
        if w_aligned:
            src = pl.multiple_of(src, 8)
        xr = x_ref[0, pl.ds(src, W), :].astype(jnp.float32)      # (W, C)
        y = xr * a_coef + b_coef
        # SiLU: exp + approximate reciprocal both ride the EUP slot.
        act = y * pl.reciprocal(1.0 + jnp.exp(-y), approx=True)
        row = jnp.concatenate([z_left, act.astype(pad_ref.dtype), z_right],
                              axis=0)                            # (Wp, C)
        dst = pl.multiple_of((r + 1) * Wp, sub)
        pad_ref[pl.ds(dst, Wp), :] = row
        return carry

    lax.fori_loop(0, H, build_row, 0)

    # ---- 3x3 conv: 9 shifted MXU matmuls per row-chunk, f32 accumulation.
    bias = cb_ref[...].astype(jnp.float32)                       # (1, Cout)
    num_chunks = H // CH

    def conv_chunk(c, carry):
        base = pl.multiple_of(c * (CH * Wp), sub)
        acc = jnp.dot(pad_ref[pl.ds(base, CH * Wp), :], w_ref[0],
                      preferred_element_type=jnp.float32)        # first tap, no zeros init
        for t in range(1, 9):
            off = (t // 3) * Wp + (t % 3)
            acc = acc + jnp.dot(pad_ref[pl.ds(base + off, CH * Wp), :], w_ref[t],
                                preferred_element_type=jnp.float32)
        acc = acc + bias
        # Trim the junk pad columns in-kernel (static slices + sublane concat),
        # then one lane-dense store of the valid rows for this chunk.
        valid = jnp.concatenate([acc[i * Wp:i * Wp + W, :] for i in range(CH)],
                                axis=0)                          # (CH*W, Cout)
        dst = c * (CH * W)
        if w_aligned:
            dst = pl.multiple_of(dst, 8)
        o_ref[0, pl.ds(dst, CH * W), :] = valid.astype(o_ref.dtype)
        return carry

    lax.fori_loop(0, num_chunks, conv_chunk, 0)


def block_forward_nhwc(x_nhwc, params, scale_shift=None, *, groups=8,
                       eps=1e-5, norm=True, conv_dtype=jnp.bfloat16):
    """Block forward in NHWC (preferred entry point: no HBM transposes)."""
    gamma, beta, conv_w, conv_b = params
    B, H, W, C = x_nhwc.shape
    Cout = conv_w.shape[0]
    assert conv_w.shape == (Cout, C, 3, 3), conv_w.shape
    if norm:
        assert C % groups == 0, "GroupNorm requires channels % groups == 0"

    conv_dtype = jnp.dtype(conv_dtype)
    sub = max(8, (8 * 4) // conv_dtype.itemsize)   # 8 for f32 slab, 16 for bf16
    Wp = _round_up(W + 2, sub)                     # sublane-aligned padded width
    HW = H * W
    P = (H + 3) * Wp                               # covers max tap read (H+2)*Wp+1

    # Conv row-chunk: largest divisor of H keeping <= ~256 flattened slab rows
    # per chunk (keeps the f32 accumulator small / mostly vreg-resident).
    target = max(Wp, 256)
    CH = max(d for d in range(1, H + 1) if H % d == 0 and d * Wp <= target)

    # Group-averaging matrix: A[c', c] = 1/(HW*cg) iff c' and c share a group.
    cg = C // groups if norm else C
    gid = jnp.arange(C) // cg
    amat = (gid[:, None] == gid[None, :]).astype(jnp.float32) / float(HW * cg)

    gamma2 = jnp.asarray(gamma).reshape(1, C).astype(jnp.float32)
    beta2 = jnp.asarray(beta).reshape(1, C).astype(jnp.float32)

    has_film = scale_shift is not None
    if has_film:
        scale, shift = scale_shift
        scale3 = jnp.asarray(scale).reshape(B, 1, C).astype(jnp.float32)
        shift3 = jnp.asarray(shift).reshape(B, 1, C).astype(jnp.float32)
    else:  # unused inside the kernel (has_film is a static flag)
        scale3 = jnp.zeros((B, 1, C), jnp.float32)
        shift3 = jnp.zeros((B, 1, C), jnp.float32)

    # (Cout, Cin, 3, 3) -> (9, Cin, Cout), tap-major, optionally bf16.
    w9 = jnp.transpose(conv_w, (2, 3, 1, 0)).reshape(9, C, Cout).astype(conv_dtype)
    cb2 = jnp.asarray(conv_b).reshape(1, Cout).astype(jnp.float32)

    x_flat = x_nhwc.reshape(B, HW, C)              # free reshape, channels-last
    out_dtype = x_nhwc.dtype

    # VMEM budget from the real footprint, capped under this chip's physical VMEM.
    in_b = jnp.dtype(x_nhwc.dtype).itemsize
    out_b = jnp.dtype(out_dtype).itemsize
    cv_b = conv_dtype.itemsize
    est = (2 * HW * C * in_b                       # x block (double-buffered)
           + 2 * HW * Cout * out_b                 # output block
           + 2 * 9 * C * Cout * cv_b               # conv weight block
           + 2 * C * C * 4                         # group-averaging matrix
           + P * C * cv_b                          # padded activation slab
           + 16 * (C + Cout) * 4)                  # per-channel params
    try:
        phys = int(pltpu.get_tpu_info().vmem_capacity_bytes)
    except Exception:
        phys = 64 * 1024 * 1024                    # conservative (v7x per-TC)
    cap = (phys * 3) // 4
    vmem_limit = int(min(max(2 * est, 32 * 1024 * 1024), cap))

    kernel = functools.partial(_block_kernel, H=H, W=W, Wp=Wp, CH=CH, sub=sub,
                               eps=eps, use_norm=norm, has_film=has_film)

    out_flat = pl.pallas_call(
        kernel,
        out_shape=jax.ShapeDtypeStruct((B, HW, Cout), out_dtype),
        grid_spec=pltpu.PrefetchScalarGridSpec(
            num_scalar_prefetch=0,
            grid=(B,),
            in_specs=[
                pl.BlockSpec((1, HW, C), lambda b: (b, 0, 0)),       # x
                pl.BlockSpec((C, C), lambda b: (0, 0)),              # amat
                pl.BlockSpec((1, C), lambda b: (0, 0)),              # gamma
                pl.BlockSpec((1, C), lambda b: (0, 0)),              # beta
                pl.BlockSpec((1, 1, C), lambda b: (b, 0, 0)),        # scale
                pl.BlockSpec((1, 1, C), lambda b: (b, 0, 0)),        # shift
                pl.BlockSpec((9, C, Cout), lambda b: (0, 0, 0)),     # conv w
                pl.BlockSpec((1, Cout), lambda b: (0, 0)),           # conv b
            ],
            out_specs=pl.BlockSpec((1, HW, Cout), lambda b: (b, 0, 0)),
            scratch_shapes=[pltpu.VMEM((P, C), conv_dtype)],
        ),
        compiler_params=pltpu.CompilerParams(
            dimension_semantics=("parallel",),
            vmem_limit_bytes=vmem_limit),
    )(x_flat, amat, gamma2, beta2, scale3, shift3, w9, cb2)

    return out_flat.reshape(B, H, W, Cout)


def block_forward_nchw(x_nchw, params, scale_shift=None, **kwargs):
    """PyTorch-layout (NCHW) convenience wrapper around the NHWC kernel."""
    x_nhwc = jnp.transpose(x_nchw, (0, 2, 3, 1))
    y_nhwc = block_forward_nhwc(x_nhwc, params, scale_shift, **kwargs)
    return jnp.transpose(y_nhwc, (0, 3, 1, 2))


def block_reference_nchw(x_nchw, params, scale_shift=None, *, groups=8,
                         eps=1e-5, norm=True):
    """Plain-JAX reference mirroring the PyTorch module (f32 throughout)."""
    gamma, beta, conv_w, conv_b = params
    B, C, H, W = x_nchw.shape
    x = x_nchw.astype(jnp.float32)
    if norm:
        xg = x.reshape(B, groups, C // groups, H, W)
        mean = xg.mean(axis=(2, 3, 4), keepdims=True)
        var = ((xg - mean) ** 2).mean(axis=(2, 3, 4), keepdims=True)
        xg = (xg - mean) / jnp.sqrt(var + eps)
        x = xg.reshape(B, C, H, W)
        x = x * gamma.reshape(1, C, 1, 1) + beta.reshape(1, C, 1, 1)
    if scale_shift is not None:
        scale, shift = scale_shift
        x = x * (scale.reshape(B, C, 1, 1) + 1.0) + shift.reshape(B, C, 1, 1)
    x = x * jax.nn.sigmoid(x)
    y = lax.conv_general_dilated(
        x, conv_w.astype(jnp.float32), window_strides=(1, 1), padding="SAME",
        dimension_numbers=("NCHW", "OIHW", "NCHW"),
        precision=lax.Precision.HIGHEST)
    return y + conv_b.reshape(1, -1, 1, 1)


if __name__ == "__main__":
    key = jax.random.PRNGKey(0)
    kx, kg, kb, kw_, kcb, ks, ksh = jax.random.split(key, 7)

    B, C, H, W = 2, 16, 16, 16        # dim=16 so groups=8 divides channels
    Cout, groups = 32, 8

    x = jax.random.normal(kx, (B, C, H, W), jnp.float32)            # NCHW like PyTorch
    gamma = 1.0 + 0.1 * jax.random.normal(kg, (C,), jnp.float32)
    beta = 0.1 * jax.random.normal(kb, (C,), jnp.float32)
    fan_in = C * 9
    wbound = (6.0 / fan_in) ** 0.5                                   # kaiming_uniform_
    conv_w = jax.random.uniform(kw_, (Cout, C, 3, 3), jnp.float32, -wbound, wbound)
    bbound = 1.0 / fan_in ** 0.5
    conv_b = jax.random.uniform(kcb, (Cout,), jnp.float32, -bbound, bbound)
    scale = 0.1 * jax.random.normal(ks, (B, C), jnp.float32)
    shift = 0.1 * jax.random.normal(ksh, (B, C), jnp.float32)

    params = (gamma, beta, conv_w, conv_b)
    scale_shift = (scale, shift)

    y_ref = block_reference_nchw(x, params, scale_shift, groups=groups)

    # f32 matmul path: tight check.
    y_f32 = block_forward_nchw(x, params, scale_shift, groups=groups,
                               conv_dtype=jnp.float32)
    y_f32 = jax.block_until_ready(y_f32)
    assert y_f32.shape == (B, Cout, H, W), y_f32.shape
    err_f32 = float(jnp.max(jnp.abs(y_f32 - y_ref)))
    assert err_f32 < 3e-2, err_f32

    # bf16 matmul path (production default): looser check.
    y_bf16 = block_forward_nchw(x, params, scale_shift, groups=groups,
                                conv_dtype=jnp.bfloat16)
    y_bf16 = jax.block_until_ready(y_bf16)
    assert y_bf16.shape == (B, Cout, H, W), y_bf16.shape
    err_bf16 = float(jnp.max(jnp.abs(y_bf16 - y_ref)))
    assert err_bf16 < 1.5e-1, err_bf16

    print("KERNEL_OK")
</pallas_src>

<mosaic_0001>
module attributes {stable_mosaic.version = 11 : i64} {
  func.func @_block_kernel(%arg0: i32, %arg1: memref<1x256x16xf32, #tpu.memory_space<vmem>>, %arg2: memref<16x16xf32, #tpu.memory_space<vmem>>, %arg3: memref<1x16xf32, #tpu.memory_space<vmem>>, %arg4: memref<1x16xf32, #tpu.memory_space<vmem>>, %arg5: memref<1x1x16xf32, #tpu.memory_space<vmem>>, %arg6: memref<1x1x16xf32, #tpu.memory_space<vmem>>, %arg7: memref<9x16x32xf32, #tpu.memory_space<vmem>>, %arg8: memref<1x32xf32, #tpu.memory_space<vmem>>, %arg9: memref<1x256x32xf32, #tpu.memory_space<vmem>>, %arg10: memref<456x16xf32, #tpu.memory_space<vmem>>) attributes {dimension_semantics = [#tpu.dimension_semantics<parallel>], iteration_bounds = array<i64: 2>, scalar_prefetch = 0 : i64, scratch_operands = 1 : i64, tpu.core_type = #tpu.core_type<tc>, window_params = [{transform_indices = @transform_0, window_bounds = array<i64: 1, 256, 16>}, {pipeline_mode = #tpu.pipeline_mode<synchronous>, transform_indices = @transform_1, window_bounds = array<i64: 16, 16>}, {pipeline_mode = #tpu.pipeline_mode<synchronous>, transform_indices = @transform_2, window_bounds = array<i64: 1, 16>}, {pipeline_mode = #tpu.pipeline_mode<synchronous>, transform_indices = @transform_3, window_bounds = array<i64: 1, 16>}, {transform_indices = @transform_4, window_bounds = array<i64: 1, 1, 16>}, {transform_indices = @transform_5, window_bounds = array<i64: 1, 1, 16>}, {pipeline_mode = #tpu.pipeline_mode<synchronous>, transform_indices = @transform_6, window_bounds = array<i64: 9, 16, 32>}, {pipeline_mode = #tpu.pipeline_mode<synchronous>, transform_indices = @transform_7, window_bounds = array<i64: 1, 32>}, {transform_indices = @transform_8, window_bounds = array<i64: 1, 256, 32>}]} {
    %c0 = arith.constant 0 : index
    %c0_0 = arith.constant 0 : index
    %c0_1 = arith.constant 0 : index
    %0 = vector.load %arg1[%c0, %c0_0, %c0_1] : memref<1x256x16xf32, #tpu.memory_space<vmem>>, vector<1x256x16xf32>
    %1 = vector.shape_cast %0 : vector<1x256x16xf32> to vector<256x16xf32>
    %cst = arith.constant dense<0.000000e+00> : vector<16xf32>
    %2 = vector.multi_reduction <add>, %1, %cst [0] : vector<256x16xf32> to vector<16xf32>
    %3 = vector.shape_cast %2 : vector<16xf32> to vector<1x16xf32>
    %4 = arith.mulf %1, %1 : vector<256x16xf32>
    %cst_2 = arith.constant dense<0.000000e+00> : vector<16xf32>
    %5 = vector.multi_reduction <add>, %4, %cst_2 [0] : vector<256x16xf32> to vector<16xf32>
    %6 = vector.shape_cast %5 : vector<16xf32> to vector<1x16xf32>
    %c0_3 = arith.constant 0 : index
    %c0_4 = arith.constant 0 : index
    %7 = vector.load %arg2[%c0_3, %c0_4] : memref<16x16xf32, #tpu.memory_space<vmem>>, vector<16x16xf32>
    %cst_5 = arith.constant dense<0.000000e+00> : vector<1x16xf32>
    %8 = tpu.matmul %3, %7, %cst_5 {dimension_numbers = #tpu.dot_dimension_numbers<[1], [0], [0], [1], [0, 0, 1, 1], [], []>} : vector<1x16xf32>, vector<16x16xf32>, vector<1x16xf32> -> vector<1x16xf32>
    %c0_6 = arith.constant 0 : index
    %c0_7 = arith.constant 0 : index
    %9 = vector.load %arg2[%c0_6, %c0_7] : memref<16x16xf32, #tpu.memory_space<vmem>>, vector<16x16xf32>
    %cst_8 = arith.constant dense<0.000000e+00> : vector<1x16xf32>
    %10 = tpu.matmul %6, %9, %cst_8 {dimension_numbers = #tpu.dot_dimension_numbers<[1], [0], [0], [1], [0, 0, 1, 1], [], []>} : vector<1x16xf32>, vector<16x16xf32>, vector<1x16xf32> -> vector<1x16xf32>
    %11 = arith.mulf %8, %8 : vector<1x16xf32>
    %12 = arith.subf %10, %11 : vector<1x16xf32>
    %cst_9 = arith.constant 9.99999974E-6 : f32
    %13 = vector.broadcast %cst_9 : f32 to vector<1x16xf32>
    %14 = arith.addf %12, %13 : vector<1x16xf32>
    %15 = math.rsqrt %14 : vector<1x16xf32>
    %c0_10 = arith.constant 0 : index
    %c0_11 = arith.constant 0 : index
    %16 = vector.load %arg3[%c0_10, %c0_11] : memref<1x16xf32, #tpu.memory_space<vmem>>, vector<1x16xf32>
    %17 = arith.mulf %15, %16 : vector<1x16xf32>
    %c0_12 = arith.constant 0 : index
    %c0_13 = arith.constant 0 : index
    %18 = vector.load %arg4[%c0_12, %c0_13] : memref<1x16xf32, #tpu.memory_space<vmem>>, vector<1x16xf32>
    %19 = arith.mulf %8, %17 : vector<1x16xf32>
    %20 = arith.subf %18, %19 : vector<1x16xf32>
    %c0_14 = arith.constant 0 : index
    %c0_15 = arith.constant 0 : index
    %c0_16 = arith.constant 0 : index
    %21 = vector.load %arg5[%c0_14, %c0_15, %c0_16] : memref<1x1x16xf32, #tpu.memory_space<vmem>>, vector<1x1x16xf32>
    %22 = vector.shape_cast %21 : vector<1x1x16xf32> to vector<1x16xf32>
    %cst_17 = arith.constant 1.000000e+00 : f32
    %23 = vector.broadcast %cst_17 : f32 to vector<1x16xf32>
    %24 = arith.addf %22, %23 : vector<1x16xf32>
    %c0_18 = arith.constant 0 : index
    %c0_19 = arith.constant 0 : index
    %c0_20 = arith.constant 0 : index
    %25 = vector.load %arg6[%c0_18, %c0_19, %c0_20] : memref<1x1x16xf32, #tpu.memory_space<vmem>>, vector<1x1x16xf32>
    %26 = vector.shape_cast %25 : vector<1x1x16xf32> to vector<1x16xf32>
    %27 = arith.mulf %17, %24 : vector<1x16xf32>
    %28 = arith.mulf %20, %24 : vector<1x16xf32>
    %29 = arith.addf %28, %26 : vector<1x16xf32>
    %30 = vector.shape_cast %27 : vector<1x16xf32> to vector<1x16xf32>
    %31 = vector.broadcast %30 : vector<1x16xf32> to vector<16x16xf32>
    %32 = vector.shape_cast %29 : vector<1x16xf32> to vector<1x16xf32>
    %33 = vector.broadcast %32 : vector<1x16xf32> to vector<16x16xf32>
    %cst_21 = arith.constant 0.000000e+00 : f32
    %34 = vector.broadcast %cst_21 : f32 to vector<24x16xf32>
    %c0_22 = arith.constant 0 : index
    %c0_23 = arith.constant 0 : index
    %35 = vector.load %arg10[%c0_22, %c0_23] : memref<456x16xf32, #tpu.memory_space<vmem>>, vector<24x16xf32>
    tpu.vector_store %arg10[%c0_22, %c0_23], %34 {strides = array<i32>} : memref<456x16xf32, #tpu.memory_space<vmem>>, vector<24x16xf32>,
    %cst_24 = arith.constant 0.000000e+00 : f32
    %36 = vector.broadcast %cst_24 : f32 to vector<48x16xf32>
    %c408 = arith.constant 408 : index
    %c0_25 = arith.constant 0 : index
    %37 = vector.load %arg10[%c408, %c0_25] : memref<456x16xf32, #tpu.memory_space<vmem>>, vector<48x16xf32>
    tpu.vector_store %arg10[%c408, %c0_25], %36 {strides = array<i32>} : memref<456x16xf32, #tpu.memory_space<vmem>>, vector<48x16xf32>,
    %cst_26 = arith.constant 0.000000e+00 : f32
    %38 = vector.broadcast %cst_26 : f32 to vector<1x16xf32>
    %cst_27 = arith.constant 0.000000e+00 : f32
    %39 = vector.broadcast %cst_27 : f32 to vector<7x16xf32>
    %c0_i32 = arith.constant 0 : i32
    %c16_i32 = arith.constant 16 : i32
    %40 = arith.addi %c0_i32, %c16_i32 : i32
    %c1_i32 = arith.constant 1 : i32
    scf.for %arg11 = %c0_i32 to %40 step %c1_i32  : i32 {
      %c16_i32_34 = arith.constant 16 : i32
      %43 = arith.muli %arg11, %c16_i32_34 : i32
      %44 = tpu.assume_multiple %43, 8 : i32
      %c0_35 = arith.constant 0 : index
      %45 = arith.index_cast %44 : i32 to index
      %c0_36 = arith.constant 0 : index
      %46 = vector.load %arg1[%c0_35, %45, %c0_36] : memref<1x256x16xf32, #tpu.memory_space<vmem>>, vector<1x16x16xf32>
      %47 = vector.shape_cast %46 : vector<1x16x16xf32> to vector<16x16xf32>
      %48 = arith.mulf %47, %31 : vector<16x16xf32>
      %49 = arith.addf %48, %33 : vector<16x16xf32>
      %cst_37 = arith.constant 0.000000e+00 : f32
      %50 = vector.broadcast %cst_37 : f32 to vector<16x16xf32>
      %51 = arith.subf %50, %49 : vector<16x16xf32>
      %52 = math.exp %51 : vector<16x16xf32>
      %cst_38 = arith.constant 1.000000e+00 : f32
      %53 = vector.broadcast %cst_38 : f32 to vector<16x16xf32>
      %54 = arith.addf %53, %52 : vector<16x16xf32>
      %55 = tpu.reciprocal %54 {approx = true} : vector<16x16xf32> -> vector<16x16xf32>
      %56 = arith.mulf %49, %55 : vector<16x16xf32>
      %57 = tpu.concatenate %38, %56, %39 in 0 : vector<1x16xf32>, vector<16x16xf32>, vector<7x16xf32> -> vector<24x16xf32>
      %c1_i32_39 = arith.constant 1 : i32
      %58 = arith.addi %arg11, %c1_i32_39 : i32
      %c24_i32 = arith.constant 24 : i32
      %59 = arith.muli %58, %c24_i32 : i32
      %60 = tpu.assume_multiple %59, 8 : i32
      %61 = arith.index_cast %60 : i32 to index
      %c0_40 = arith.constant 0 : index
      %62 = vector.load %arg10[%61, %c0_40] : memref<456x16xf32, #tpu.memory_space<vmem>>, vector<24x16xf32>
      tpu.vector_store %arg10[%61, %c0_40], %57 {strides = array<i32>} : memref<456x16xf32, #tpu.memory_space<vmem>>, vector<24x16xf32>,
    }
    %c16_i32_28 = arith.constant 16 : i32
    %c0_29 = arith.constant 0 : index
    %c0_30 = arith.constant 0 : index
    %41 = vector.load %arg8[%c0_29, %c0_30] : memref<1x32xf32, #tpu.memory_space<vmem>>, vector<1x32xf32>
    %c0_i32_31 = arith.constant 0 : i32
    %c2_i32 = arith.constant 2 : i32
    %42 = arith.addi %c0_i32_31, %c2_i32 : i32
    %c1_i32_32 = arith.constant 1 : i32
    scf.for %arg11 = %c0_i32_31 to %42 step %c1_i32_32  : i32 {
      %c192_i32 = arith.constant 192 : i32
      %43 = arith.muli %arg11, %c192_i32 : i32
      %44 = tpu.assume_multiple %43, 8 : i32
      %45 = arith.index_cast %44 : i32 to index
      %c0_34 = arith.constant 0 : index
      %46 = vector.load %arg10[%45, %c0_34] : memref<456x16xf32, #tpu.memory_space<vmem>>, vector<192x16xf32>
      %c0_35 = arith.constant 0 : index
      %c0_36 = arith.constant 0 : index
      %c0_37 = arith.constant 0 : index
      %47 = vector.load %arg7[%c0_35, %c0_36, %c0_37] : memref<9x16x32xf32, #tpu.memory_space<vmem>>, vector<1x16x32xf32>
      %48 = vector.shape_cast %47 : vector<1x16x32xf32> to vector<16x32xf32>
      %cst_38 = arith.constant dense<0.000000e+00> : vector<192x32xf32>
      %49 = tpu.matmul %46, %48, %cst_38 {dimension_numbers = #tpu.dot_dimension_numbers<[1], [0], [0], [1], [0, 0, 1, 1], [], []>} : vector<192x16xf32>, vector<16x32xf32>, vector<192x32xf32> -> vector<192x32xf32>
      %c1_i32_39 = arith.constant 1 : i32
      %50 = arith.addi %44, %c1_i32_39 : i32
      %51 = arith.index_cast %50 : i32 to index
      %c0_40 = arith.constant 0 : index
      %52 = vector.load %arg10[%51, %c0_40] : memref<456x16xf32, #tpu.memory_space<vmem>>, vector<192x16xf32>
      %c1 = arith.constant 1 : index
      %c0_41 = arith.constant 0 : index
      %c0_42 = arith.constant 0 : index
      %53 = vector.load %arg7[%c1, %c0_41, %c0_42] : memref<9x16x32xf32, #tpu.memory_space<vmem>>, vector<1x16x32xf32>
      %54 = vector.shape_cast %53 : vector<1x16x32xf32> to vector<16x32xf32>
      %cst_43 = arith.constant dense<0.000000e+00> : vector<192x32xf32>
      %55 = tpu.matmul %52, %54, %cst_43 {dimension_numbers = #tpu.dot_dimension_numbers<[1], [0], [0], [1], [0, 0, 1, 1], [], []>} : vector<192x16xf32>, vector<16x32xf32>, vector<192x32xf32> -> vector<192x32xf32>
      %56 = arith.addf %49, %55 : vector<192x32xf32>
      %c2_i32_44 = arith.constant 2 : i32
      %57 = arith.addi %44, %c2_i32_44 : i32
      %58 = arith.index_cast %57 : i32 to index
      %c0_45 = arith.constant 0 : index
      %59 = vector.load %arg10[%58, %c0_45] : memref<456x16xf32, #tpu.memory_space<vmem>>, vector<192x16xf32>
      %c2 = arith.constant 2 : index
      %c0_46 = arith.constant 0 : index
      %c0_47 = arith.constant 0 : index
      %60 = vector.load %arg7[%c2, %c0_46, %c0_47] : memref<9x16x32xf32, #tpu.memory_space<vmem>>, vector<1x16x32xf32>
      %61 = vector.shape_cast %60 : vector<1x16x32xf32> to vector<16x32xf32>
      %cst_48 = arith.constant dense<0.000000e+00> : vector<192x32xf32>
      %62 = tpu.matmul %59, %61, %cst_48 {dimension_numbers = #tpu.dot_dimension_numbers<[1], [0], [0], [1], [0, 0, 1, 1], [], []>} : vector<192x16xf32>, vector<16x32xf32>, vector<192x32xf32> -> vector<192x32xf32>
      %63 = arith.addf %56, %62 : vector<192x32xf32>
      %c24_i32 = arith.constant 24 : i32
      %64 = arith.addi %44, %c24_i32 : i32
      %65 = arith.index_cast %64 : i32 to index
      %c0_49 = arith.constant 0 : index
      %66 = vector.load %arg10[%65, %c0_49] : memref<456x16xf32, #tpu.memory_space<vmem>>, vector<192x16xf32>
      %c3 = arith.constant 3 : index
      %c0_50 = arith.constant 0 : index
      %c0_51 = arith.constant 0 : index
      %67 = vector.load %arg7[%c3, %c0_50, %c0_51] : memref<9x16x32xf32, #tpu.memory_space<vmem>>, vector<1x16x32xf32>
      %68 = vector.shape_cast %67 : vector<1x16x32xf32> to vector<16x32xf32>
      %cst_52 = arith.constant dense<0.000000e+00> : vector<192x32xf32>
      %69 = tpu.matmul %66, %68, %cst_52 {dimension_numbers = #tpu.dot_dimension_numbers<[1], [0], [0], [1], [0, 0, 1, 1], [], []>} : vector<192x16xf32>, vector<16x32xf32>, vector<192x32xf32> -> vector<192x32xf32>
      %70 = arith.addf %63, %69 : vector<192x32xf32>
      %c25_i32 = arith.constant 25 : i32
      %71 = arith.addi %44, %c25_i32 : i32
      %72 = arith.index_cast %71 : i32 to index
      %c0_53 = arith.constant 0 : index
      %73 = vector.load %arg10[%72, %c0_53] : memref<456x16xf32, #tpu.memory_space<vmem>>, vector<192x16xf32>
      %c4 = arith.constant 4 : index
      %c0_54 = arith.constant 0 : index
      %c0_55 = arith.constant 0 : index
      %74 = vector.load %arg7[%c4, %c0_54, %c0_55] : memref<9x16x32xf32, #tpu.memory_space<vmem>>, vector<1x16x32xf32>
      %75 = vector.shape_cast %74 : vector<1x16x32xf32> to vector<16x32xf32>
      %cst_56 = arith.constant dense<0.000000e+00> : vector<192x32xf32>
      %76 = tpu.matmul %73, %75, %cst_56 {dimension_numbers = #tpu.dot_dimension_numbers<[1], [0], [0], [1], [0, 0, 1, 1], [], []>} : vector<192x16xf32>, vector<16x32xf32>, vector<192x32xf32> -> vector<192x32xf32>
      %77 = arith.addf %70, %76 : vector<192x32xf32>
      %c26_i32 = arith.constant 26 : i32
      %78 = arith.addi %44, %c26_i32 : i32
      %79 = arith.index_cast %78 : i32 to index
      %c0_57 = arith.constant 0 : index
      %80 = vector.load %arg10[%79, %c0_57] : memref<456x16xf32, #tpu.memory_space<vmem>>, vector<192x16xf32>
      %c5 = arith.constant 5 : index
      %c0_58 = arith.constant 0 : index
      %c0_59 = arith.constant 0 : index
      %81 = vector.load %arg7[%c5, %c0_58, %c0_59] : memref<9x16x32xf32, #tpu.memory_space<vmem>>, vector<1x16x32xf32>
      %82 = vector.shape_cast %81 : vector<1x16x32xf32> to vector<16x32xf32>
      %cst_60 = arith.constant dense<0.000000e+00> : vector<192x32xf32>
      %83 = tpu.matmul %80, %82, %cst_60 {dimension_numbers = #tpu.dot_dimension_numbers<[1], [0], [0], [1], [0, 0, 1, 1], [], []>} : vector<192x16xf32>, vector<16x32xf32>, vector<192x32xf32> -> vector<192x32xf32>
      %84 = arith.addf %77, %83 : vector<192x32xf32>
      %c48_i32 = arith.constant 48 : i32
      %85 = arith.addi %44, %c48_i32 : i32
      %86 = arith.index_cast %85 : i32 to index
      %c0_61 = arith.constant 0 : index
      %87 = vector.load %arg10[%86, %c0_61] : memref<456x16xf32, #tpu.memory_space<vmem>>, vector<192x16xf32>
      %c6 = arith.constant 6 : index
      %c0_62 = arith.constant 0 : index
      %c0_63 = arith.constant 0 : index
      %88 = vector.load %arg7[%c6, %c0_62, %c0_63] : memref<9x16x32xf32, #tpu.memory_space<vmem>>, vector<1x16x32xf32>
      %89 = vector.shape_cast %88 : vector<1x16x32xf32> to vector<16x32xf32>
      %cst_64 = arith.constant dense<0.000000e+00> : vector<192x32xf32>
      %90 = tpu.matmul %87, %89, %cst_64 {dimension_numbers = #tpu.dot_dimension_numbers<[1], [0], [0], [1], [0, 0, 1, 1], [], []>} : vector<192x16xf32>, vector<16x32xf32>, vector<192x32xf32> -> vector<192x32xf32>
      %91 = arith.addf %84, %90 : vector<192x32xf32>
      %c49_i32 = arith.constant 49 : i32
      %92 = arith.addi %44, %c49_i32 : i32
      %93 = arith.index_cast %92 : i32 to index
      %c0_65 = arith.constant 0 : index
      %94 = vector.load %arg10[%93, %c0_65] : memref<456x16xf32, #tpu.memory_space<vmem>>, vector<192x16xf32>
      %c7 = arith.constant 7 : index
      %c0_66 = arith.constant 0 : index
      %c0_67 = arith.constant 0 : index
      %95 = vector.load %arg7[%c7, %c0_66, %c0_67] : memref<9x16x32xf32, #tpu.memory_space<vmem>>, vector<1x16x32xf32>
      %96 = vector.shape_cast %95 : vector<1x16x32xf32> to vector<16x32xf32>
      %cst_68 = arith.constant dense<0.000000e+00> : vector<192x32xf32>
      %97 = tpu.matmul %94, %96, %cst_68 {dimension_numbers = #tpu.dot_dimension_numbers<[1], [0], [0], [1], [0, 0, 1, 1], [], []>} : vector<192x16xf32>, vector<16x32xf32>, vector<192x32xf32> -> vector<192x32xf32>
      %98 = arith.addf %91, %97 : vector<192x32xf32>
      %c50_i32 = arith.constant 50 : i32
      %99 = arith.addi %44, %c50_i32 : i32
      %100 = arith.index_cast %99 : i32 to index
      %c0_69 = arith.constant 0 : index
      %101 = vector.load %arg10[%100, %c0_69] : memref<456x16xf32, #tpu.memory_space<vmem>>, vector<192x16xf32>
      %c8 = arith.constant 8 : index
      %c0_70 = arith.constant 0 : index
      %c0_71 = arith.constant 0 : index
      %102 = vector.load %arg7[%c8, %c0_70, %c0_71] : memref<9x16x32xf32, #tpu.memory_space<vmem>>, vector<1x16x32xf32>
      %103 = vector.shape_cast %102 : vector<1x16x32xf32> to vector<16x32xf32>
      %cst_72 = arith.constant dense<0.000000e+00> : vector<192x32xf32>
      %104 = tpu.matmul %101, %103, %cst_72 {dimension_numbers = #tpu.dot_dimension_numbers<[1], [0], [0], [1], [0, 0, 1, 1], [], []>} : vector<192x16xf32>, vector<16x32xf32>, vector<192x32xf32> -> vector<192x32xf32>
      %105 = arith.addf %98, %104 : vector<192x32xf32>
      %106 = vector.broadcast %41 : vector<1x32xf32> to vector<192x32xf32>
      %107 = arith.addf %105, %106 : vector<192x32xf32>
      %108 = vector.extract_strided_slice %107 {offsets = [0, 0], sizes = [16, 32], strides = [1, 1]} : vector<192x32xf32> to vector<16x32xf32>
      %109 = vector.extract_strided_slice %107 {offsets = [24, 0], sizes = [16, 32], strides = [1, 1]} : vector<192x32xf32> to vector<16x32xf32>
      %110 = vector.extract_strided_slice %107 {offsets = [48, 0], sizes = [16, 32], strides = [1, 1]} : vector<192x32xf32> to vector<16x32xf32>
      %111 = vector.extract_strided_slice %107 {offsets = [72, 0], sizes = [16, 32], strides = [1, 1]} : vector<192x32xf32> to vector<16x32xf32>
      %112 = vector.extract_strided_slice %107 {offsets = [96, 0], sizes = [16, 32], strides = [1, 1]} : vector<192x32xf32> to vector<16x32xf32>
      %113 = vector.extract_strided_slice %107 {offsets = [120, 0], sizes = [16, 32], strides = [1, 1]} : vector<192x32xf32> to vector<16x32xf32>
      %114 = vector.extract_strided_slice %107 {offsets = [144, 0], sizes = [16, 32], strides = [1, 1]} : vector<192x32xf32> to vector<16x32xf32>
      %115 = vector.extract_strided_slice %107 {offsets = [168, 0], sizes = [16, 32], strides = [1, 1]} : vector<192x32xf32> to vector<16x32xf32>
      %116 = tpu.concatenate %108, %109, %110, %111, %112, %113, %114, %115 in 0 : vector<16x32xf32>, vector<16x32xf32>, vector<16x32xf32>, vector<16x32xf32>, vector<16x32xf32>, vector<16x32xf32>, vector<16x32xf32>, vector<16x32xf32> -> vector<128x32xf32>
      %c128_i32 = arith.constant 128 : i32
      %117 = arith.muli %arg11, %c128_i32 : i32
      %118 = tpu.assume_multiple %117, 8 : i32
      %c0_73 = arith.constant 0 : index
      %119 = arith.index_cast %118 : i32 to index
      %c0_74 = arith.constant 0 : index
      %120 = vector.load %arg9[%c0_73, %119, %c0_74] : memref<1x256x32xf32, #tpu.memory_space<vmem>>, vector<1x128x32xf32>
      %121 = vector.shape_cast %120 : vector<1x128x32xf32> to vector<128x32xf32>
      %122 = vector.shape_cast %116 : vector<128x32xf32> to vector<1x128x32xf32>
      tpu.vector_store %arg9[%c0_73, %119, %c0_74], %122 {strides = array<i32>} : memref<1x256x32xf32, #tpu.memory_space<vmem>>, vector<1x128x32xf32>,
    }
    %c2_i32_33 = arith.constant 2 : i32
    return
  }
  func.func @transform_0(%arg0: i32) -> (i32, i32, i32) {
    %c0_i32 = arith.constant 0 : i32
    %c0_i32_0 = arith.constant 0 : i32
    %c0_i32_1 = arith.constant 0 : i32
    return %arg0, %c0_i32, %c0_i32_0 : i32, i32, i32
  }
  func.func @transform_1(%arg0: i32) -> (i32, i32) {
    %c0_i32 = arith.constant 0 : i32
    %c0_i32_0 = arith.constant 0 : i32
    %c0_i32_1 = arith.constant 0 : i32
    return %c0_i32, %c0_i32_0 : i32, i32
  }
  func.func @transform_2(%arg0: i32) -> (i32, i32) {
    %c0_i32 = arith.constant 0 : i32
    %c0_i32_0 = arith.constant 0 : i32
    %c0_i32_1 = arith.constant 0 : i32
    return %c0_i32, %c0_i32_0 : i32, i32
  }
  func.func @transform_3(%arg0: i32) -> (i32, i32) {
    %c0_i32 = arith.constant 0 : i32
    %c0_i32_0 = arith.constant 0 : i32
    %c0_i32_1 = arith.constant 0 : i32
    return %c0_i32, %c0_i32_0 : i32, i32
  }
  func.func @transform_4(%arg0: i32) -> (i32, i32, i32) {
    %c0_i32 = arith.constant 0 : i32
    %c0_i32_0 = arith.constant 0 : i32
    %c0_i32_1 = arith.constant 0 : i32
    return %arg0, %c0_i32, %c0_i32_0 : i32, i32, i32
  }
  func.func @transform_5(%arg0: i32) -> (i32, i32, i32) {
    %c0_i32 = arith.constant 0 : i32
    %c0_i32_0 = arith.constant 0 : i32
    %c0_i32_1 = arith.constant 0 : i32
    return %arg0, %c0_i32, %c0_i32_0 : i32, i32, i32
  }
  func.func @transform_6(%arg0: i32) -> (i32, i32, i32) {
    %c0_i32 = arith.constant 0 : i32
    %c0_i32_0 = arith.constant 0 : i32
    %c0_i32_1 = arith.constant 0 : i32
    %c0_i32_2 = arith.constant 0 : i32
    return %c0_i32, %c0_i32_0, %c0_i32_1 : i32, i32, i32
  }
  func.func @transform_7(%arg0: i32) -> (i32, i32) {
    %c0_i32 = arith.constant 0 : i32
    %c0_i32_0 = arith.constant 0 : i32
    %c0_i32_1 = arith.constant 0 : i32
    return %c0_i32, %c0_i32_0 : i32, i32
  }
  func.func @transform_8(%arg0: i32) -> (i32, i32, i32) {
    %c0_i32 = arith.constant 0 : i32
    %c0_i32_0 = arith.constant 0 : i32
    %c0_i32_1 = arith.constant 0 : i32
    return %arg0, %c0_i32, %c0_i32_0 : i32, i32, i32
  }
}

</mosaic_0001>

<bundles_post_ra>
// kernel: tpu_custom_call.1
= control target key start
LH: loop header
LB: loop body
LE: loop exit
PB: predicated region body
PF: predicated region fallthrough
CT: control target
= control target key end

     0   :  { %s4709_s27 = smov 0   ;;  %s5830_s0 = inlined_call_operand.vmem [shape: f32[2,256,16], index: 0, kind: input, shape index: {}]   ;;  %s5831_s1 = inlined_call_operand.vmem [shape: f32[16,16], index: 1, kind: input, shape index: {}]   ;;  %s5832_s2 = inlined_call_operand.vmem [shape: f32[1,16], index: 2, kind: input, shape index: {}]   ;;  %s5833_s3 = inlined_call_operand.vmem [shape: f32[1,16], index: 3, kind: input, shape index: {}]   ;;  %s5834_s4 = inlined_call_operand.vmem [shape: f32[2,1,16], index: 4, kind: input, shape index: {}]   ;;  %s5835_s5 = inlined_call_operand.vmem [shape: f32[2,1,16], index: 5, kind: input, shape index: {}]   ;;  %s5836_s6 = inlined_call_operand.vmem [shape: f32[9,16,32], index: 6, kind: input, shape index: {}]   ;;  %s5837_s7 = inlined_call_operand.vmem [shape: f32[1,32], index: 7, kind: input, shape index: {}]   ;;  %s5838_s8 = inlined_call_operand.vmem [shape: f32[2,256,32], index: 8, kind: output, shape index: {}]  }
   0x1 LB: > { %s3539_s28 = sadd.s32 4294967295, %s4652_s27   ;;  %p3543_p0 = scmp.ge.s32.totalorder %s4652_s27, 1  ;;  %s4652_s27 = sphi %s4709_s27, %s18_s27  }
   0x2   : > { %p278_p1 = scmp.lt.s32.totalorder %s4652_s27, 3 }
   0x4   : > { %p279_p2 = pnand %p3543_p0, %p278_p1 }
   0x5   : > { %p4720_p3 = scmp.lt.s32.totalorder (!%p279_p2), %s3539_s28, 1  ;;  %s4863_s9 = smov (!%p279_p2), 0  }
   0x6   : > { %282 = sbr.rel (%p279_p2) target bundleno = 788 (0x314), region = 52 }
   0xb   : > { %vm366_vm0 = vcmask 130048   ;;  %v538_v0 = vld [vmem:[%s5831_s1 + $0x8] sm:$0xff]  ;;  %v4662_v1 = vmov 0.0   ;;  %v537_v2 = vld [vmem:[%s5831_s1] sm:$0xff]  ;;  %vm4663_vm1 = vmmov 0   ;;  %s5856_s28 = smov (!%p4720_p3, %s3539_s28), 1 }
   0xc   : > { %4224 = vmatprep.subr.mxu0 %v4662_v1  ;;  %710 = vst.msk [vmem:[#allocation2] sm:$0xff] %vm366_vm0, %v4662_v1  ;;  %711 = vst.msk [vmem:[#allocation2 + $0x8] sm:$0xff] %vm366_vm0, %v4662_v1  ;;  %4231 = vmatprep.subr.mxu1 %v4662_v1  ;;  %s3982_s12 = sshll.u32 %s5856_s28, 8  ;;  %s325_s21 = scalar_lea.vmem %s5834_s4, %s5856_s28 }
   0xd   : > { %712 = vst.msk [vmem:[#allocation2 + $0x10] sm:$0xff] %vm366_vm0, %v4662_v1  ;;  %713 = vst.msk [vmem:[#allocation2 + $0x198] sm:$0xff] %vm366_vm0, %v4662_v1  ;;  %4225 = vmatpush3.msra.mxu0 %v538_v0  ;;  %4228 = vmatprep.mubr.msk.f32.mxu0 %vm4663_vm1, %v4662_v1  ;;  %s4744_s15 = scalar_lea.vmem %s5830_s0, %s3982_s12  ;;  %s4749_s18 = scalar_lea.vmem %s5838_s8, %s3982_s12 }
   0xe   : > { %714 = vst.msk [vmem:[#allocation2 + $0x1a0] sm:$0xff] %vm366_vm0, %v4662_v1  ;;  %715 = vst.msk [vmem:[#allocation2 + $0x1a8] sm:$0xff] %vm366_vm0, %v4662_v1  ;;  %4226 = vmatprep.subr.mxu0 %v4662_v1  ;;  %4232 = vmatpush3.msra.mxu1 %v538_v0  ;;  %v334_v3 = vld [vmem:[%s4744_s15] sm:$0xff]  ;;  %v335_v4 = vld [vmem:[%s4744_s15 + $0x8] sm:$0xff]  ;;  %s328_s30 = scalar_lea.vmem %s5835_s5, %s5856_s28 }
   0xf   : > { %716 = vst.msk [vmem:[#allocation2 + $0x1b0] sm:$0xff] %vm366_vm0, %v4662_v1  ;;  %717 = vst.msk [vmem:[#allocation2 + $0x1b8] sm:$0xff] %vm366_vm0, %v4662_v1  ;;  %4227 = vmatpush3.msra.mxu0 %v537_v2  ;;  %4233 = vmatprep.subr.mxu1 %v4662_v1  ;;  %v336_v5 = vld [vmem:[%s4744_s15 + $0x10] sm:$0xff]  ;;  %v337_v6 = vld [vmem:[%s4744_s15 + $0x18] sm:$0xff]  ;;  %v367_v7 = vsel %vm366_vm0, %v334_v3, 0.0  ;;  %v368_v8 = vsel %vm366_vm0, %v335_v4, 0.0  ;;  %v436_v32 = vmul.f32 %v334_v3, %v334_v3 }
  0x10   : > { %718 = vst.msk [vmem:[#allocation2 + $0x1c0] sm:$0xff] %vm366_vm0, %v4662_v1  ;;  %4234 = vmatpush3.msra.mxu1 %v537_v2  ;;  %4235 = vmatprep.mubr.msk.f32.mxu1 %vm4663_vm1, %v4662_v1  ;;  %v370_v9 = vsel %vm366_vm0, %v336_v5, 0.0  ;;  %v338_v10 = vld [vmem:[%s4744_s15 + $0x20] sm:$0xff]  ;;  %v369_v11 = vadd.f32 %v368_v8, %v367_v7  ;;  %v372_v12 = vsel %vm366_vm0, %v337_v6, 0.0  ;;  %v339_v13 = vld [vmem:[%s4744_s15 + $0x28] sm:$0xff]  ;;  %v340_v16 = vld [vmem:[%s4744_s15 + $0x30] sm:$0xff]  ;;  %v437_v33 = vmul.f32 %v335_v4, %v335_v4 }
  0x11   : > { %v374_v15 = vsel %vm366_vm0, %v338_v10, 0.0  ;;  %v376_v18 = vsel %vm366_vm0, %v339_v13, 0.0  ;;  %v341_v19 = vld [vmem:[%s4744_s15 + $0x38] sm:$0xff]  ;;  %v378_v21 = vsel %vm366_vm0, %v340_v16, 0.0  ;;  %v342_v22 = vld [vmem:[%s4744_s15 + $0x40] sm:$0xff]  ;;  %v343_v25 = vld [vmem:[%s4744_s15 + $0x48] sm:$0xff]  ;;  %v438_v34 = vmul.f32 %v336_v5, %v336_v5 }
  0x12   : > { %v371_v14 = vadd.f32 %v370_v9, %v369_v11  ;;  %v380_v24 = vsel %vm366_vm0, %v341_v19, 0.0  ;;  %v382_v27 = vsel %vm366_vm0, %v342_v22, 0.0  ;;  %v344_v28 = vld [vmem:[%s4744_s15 + $0x50] sm:$0xff]  ;;  %v345_v30 = vld [vmem:[%s4744_s15 + $0x58] sm:$0xff]  ;;  %v384_v31 = vsel %vm366_vm0, %v343_v25, 0.0  ;;  %v346_v38 = vld [vmem:[%s4744_s15 + $0x60] sm:$0xff] }
  0x13   : > { %v386_v36 = vsel %vm366_vm0, %v344_v28, 0.0  ;;  %v439_v37 = vmul.f32 %v337_v6, %v337_v6  ;;  %v388_v40 = vsel %vm366_vm0, %v345_v30, 0.0  ;;  %v440_v41 = vmul.f32 %v338_v10, %v338_v10  ;;  %v347_v45 = vld [vmem:[%s4744_s15 + $0x68] sm:$0xff]  ;;  %v348_v51 = vld [vmem:[%s4744_s15 + $0x70] sm:$0xff]  ;;  %v349_v57 = vld [vmem:[%s4744_s15 + $0x78] sm:$0xff] }
  0x14   : > { %v373_v17 = vadd.f32 %v372_v12, %v371_v14  ;;  %v468_v42 = vsel %vm366_vm0, %v436_v32, 0.0  ;;  %v469_v43 = vsel %vm366_vm0, %v437_v33, 0.0  ;;  %v471_v44 = vsel %vm366_vm0, %v438_v34, 0.0  ;;  %v350_v63 = vld [vmem:[%s4744_s15 + $0x80] sm:$0xff]  ;;  %v351_v5 = vld [vmem:[%s4744_s15 + $0x88] sm:$0xff]  ;;  %v352_v11 = vld [vmem:[%s4744_s15 + $0x90] sm:$0xff] }
  0x15   : > { %v470_v47 = vadd.f32 %v469_v43, %v468_v42  ;;  %v390_v48 = vsel %vm366_vm0, %v346_v38, 0.0  ;;  %v441_v49 = vmul.f32 %v339_v13, %v339_v13  ;;  %v473_v50 = vsel %vm366_vm0, %v439_v37, 0.0 }
  0x16   : > { %v375_v20 = vadd.f32 %v374_v15, %v373_v17  ;;  %v392_v54 = vsel %vm366_vm0, %v347_v45, 0.0  ;;  %v442_v55 = vmul.f32 %v340_v16, %v340_v16  ;;  %v475_v56 = vsel %vm366_vm0, %v440_v41, 0.0  ;;  %v353_v17 = vld [vmem:[%s4744_s15 + $0x98] sm:$0xff] }
  0x17   : > { %v472_v53 = vadd.f32 %v471_v44, %v470_v47  ;;  %v394_v60 = vsel %vm366_vm0, %v348_v51, 0.0  ;;  %v443_v61 = vmul.f32 %v341_v19, %v341_v19  ;;  %v477_v62 = vsel %vm366_vm0, %v441_v49, 0.0  ;;  %v357_v41 = vld [vmem:[%s4744_s15 + $0xb8] sm:$0xff]  ;;  %v358_v47 = vld [vmem:[%s4744_s15 + $0xc0] sm:$0xff] }
  0x18   : > { %v377_v23 = vadd.f32 %v376_v18, %v375_v20  ;;  %v396_v2 = vsel %vm366_vm0, %v349_v57, 0.0  ;;  %v444_v3 = vmul.f32 %v342_v22, %v342_v22  ;;  %v479_v4 = vsel %vm366_vm0, %v442_v55, 0.0 }
  0x19   : > { %v474_v59 = vadd.f32 %v473_v50, %v472_v53  ;;  %v398_v8 = vsel %vm366_vm0, %v350_v63, 0.0  ;;  %v445_v9 = vmul.f32 %v343_v25, %v343_v25  ;;  %v481_v10 = vsel %vm366_vm0, %v443_v61, 0.0  ;;  %v359_v53 = vld [vmem:[%s4744_s15 + $0xc8] sm:$0xff] }
  0x1a   : > { %v379_v26 = vadd.f32 %v378_v21, %v377_v23  ;;  %v400_v14 = vsel %vm366_vm0, %v351_v5, 0.0  ;;  %v446_v15 = vmul.f32 %v344_v28, %v344_v28  ;;  %v483_v16 = vsel %vm366_vm0, %v444_v3, 0.0  ;;  %v354_v23 = vld [vmem:[%s4744_s15 + $0xa0] sm:$0xff] }
  0x1b   : > { %v476_v1 = vadd.f32 %v475_v56, %v474_v59  ;;  %v402_v20 = vsel %vm366_vm0, %v352_v11, 0.0  ;;  %v447_v21 = vmul.f32 %v345_v30, %v345_v30  ;;  %v485_v22 = vsel %vm366_vm0, %v445_v9, 0.0  ;;  %v360_v59 = vld [vmem:[%s4744_s15 + $0xd0] sm:$0xff] }
  0x1c   : > { %v381_v29 = vadd.f32 %v380_v24, %v379_v26  ;;  %v404_v26 = vsel %vm366_vm0, %v353_v17, 0.0  ;;  %v487_v28 = vsel %vm366_vm0, %v446_v15, 0.0  ;;  %v406_v33 = vsel %vm366_vm0, %v354_v23, 0.0 }
  0x1d   : > { %v478_v7 = vadd.f32 %v477_v62, %v476_v1  ;;  %v449_v34 = vmul.f32 %v347_v45, %v347_v45  ;;  %v489_v30 = vsel %vm366_vm0, %v447_v21, 0.0  ;;  %v412_v50 = vsel %vm366_vm0, %v357_v41, 0.0  ;;  %v361_v1 = vld [vmem:[%s4744_s15 + $0xd8] sm:$0xff] }
  0x1e   : > { %v383_v35 = vadd.f32 %v382_v27, %v381_v29  ;;  %v448_v27 = vmul.f32 %v346_v38, %v346_v38  ;;  %v355_v29 = vld [vmem:[%s4744_s15 + $0xa8] sm:$0xff]  ;;  %v414_v56 = vsel %vm366_vm0, %v358_v47, 0.0  ;;  %v416_v62 = vsel %vm366_vm0, %v359_v53, 0.0 }
  0x1f   : > { %v480_v13 = vadd.f32 %v479_v4, %v478_v7  ;;  %v493_v45 = vsel %vm366_vm0, %v449_v34, 0.0  ;;  %v418_v4 = vsel %vm366_vm0, %v360_v59, 0.0  ;;  %v362_v7 = vld [vmem:[%s4744_s15 + $0xe0] sm:$0xff] }
  0x20   : > { %v385_v39 = vadd.f32 %v384_v31, %v383_v35  ;;  %v356_v35 = vld [vmem:[%s4744_s15 + $0xb0] sm:$0xff]  ;;  %v491_v38 = vsel %vm366_vm0, %v448_v27, 0.0 }
  0x21   : > { %v482_v19 = vadd.f32 %v481_v10, %v480_v13  ;;  %v410_v44 = vsel %vm366_vm0, %v356_v35, 0.0  ;;  %v420_v10 = vsel %vm366_vm0, %v361_v1, 0.0  ;;  %v363_v13 = vld [vmem:[%s4744_s15 + $0xe8] sm:$0xff] }
  0x22   : > { %v387_v46 = vadd.f32 %v386_v36, %v385_v39  ;;  %v408_v39 = vsel %vm366_vm0, %v355_v29, 0.0 }
  0x23   : > { %v484_v25 = vadd.f32 %v483_v16, %v482_v19  ;;  %v422_v16 = vsel %vm366_vm0, %v362_v7, 0.0 }
  0x24   : > { %v389_v52 = vadd.f32 %v388_v40, %v387_v46  ;;  %v450_v40 = vmul.f32 %v348_v51, %v348_v51  ;;  %v451_v46 = vmul.f32 %v349_v57, %v349_v57 }
  0x25   : > { %v486_v32 = vadd.f32 %v485_v22, %v484_v25  ;;  %v424_v22 = vsel %vm366_vm0, %v363_v13, 0.0 }
  0x26   : > { %v391_v58 = vadd.f32 %v390_v48, %v389_v52  ;;  %v452_v52 = vmul.f32 %v350_v63, %v350_v63  ;;  %v495_v51 = vsel %vm366_vm0, %v450_v40, 0.0  ;;  %v497_v57 = vsel %vm366_vm0, %v451_v46, 0.0 }
  0x27   : > { %v488_v37 = vadd.f32 %v487_v28, %v486_v32 }
  0x28   : > { %v393_v0 = vadd.f32 %v392_v54, %v391_v58  ;;  %v453_v58 = vmul.f32 %v351_v5, %v351_v5  ;;  %v499_v63 = vsel %vm366_vm0, %v452_v52, 0.0 }
  0x29   : > { %v490_v43 = vadd.f32 %v489_v30, %v488_v37  ;;  %v460_v30 = vmul.f32 %v358_v47, %v358_v47  ;;  %v464_v47 = vmul.f32 %v362_v7, %v362_v7 }
  0x2a   : > { %v395_v6 = vadd.f32 %v394_v60, %v393_v0  ;;  %v454_v0 = vmul.f32 %v352_v11, %v352_v11  ;;  %v501_v5 = vsel %vm366_vm0, %v453_v58, 0.0 }
  0x2b   : > { %v492_v49 = vadd.f32 %v491_v38, %v490_v43  ;;  %v462_v43 = vmul.f32 %v360_v59, %v360_v59  ;;  %v523_v59 = vsel %vm366_vm0, %v464_v47, 0.0 }
  0x2c   : > { %v397_v12 = vadd.f32 %v396_v2, %v395_v6  ;;  %v455_v6 = vmul.f32 %v353_v17, %v353_v17  ;;  %v503_v11 = vsel %vm366_vm0, %v454_v0, 0.0  ;;  %v364_v17 = vld [vmem:[%s4744_s15 + $0xf0] sm:$0xff] }
  0x2d   : > { %v494_v55 = vadd.f32 %v493_v45, %v492_v49  ;;  %v426_v28 = vsel %vm366_vm0, %v364_v17, 0.0  ;;  %v463_v45 = vmul.f32 %v361_v1, %v361_v1  ;;  %v519_v52 = vsel %vm366_vm0, %v462_v43, 0.0 }
  0x2e   : > { %v399_v18 = vadd.f32 %v398_v8, %v397_v12  ;;  %v456_v12 = vmul.f32 %v354_v23, %v354_v23  ;;  %v505_v19 = vsel %vm366_vm0, %v455_v6, 0.0 }
  0x2f   : > { %v496_v61 = vadd.f32 %v495_v51, %v494_v55  ;;  %v521_v55 = vsel %vm366_vm0, %v463_v45, 0.0 }
  0x30   : > { %v401_v24 = vadd.f32 %v400_v14, %v399_v18  ;;  %v457_v18 = vmul.f32 %v355_v29, %v355_v29  ;;  %v507_v25 = vsel %vm366_vm0, %v456_v12, 0.0 }
  0x31   : > { %v498_v3 = vadd.f32 %v497_v57, %v496_v61  ;;  %v466_v57 = vmul.f32 %v364_v17, %v364_v17 }
  0x32   : > { %v403_v31 = vadd.f32 %v402_v20, %v401_v24  ;;  %v458_v24 = vmul.f32 %v356_v35, %v356_v35  ;;  %v509_v32 = vsel %vm366_vm0, %v457_v18, 0.0  ;;  %v461_v35 = vmul.f32 %v359_v53, %v359_v53 }
  0x33   : > { %v500_v9 = vadd.f32 %v499_v63, %v498_v3  ;;  %v465_v53 = vmul.f32 %v363_v13, %v363_v13 }
  0x34   : > { %v405_v36 = vadd.f32 %v404_v26, %v403_v31  ;;  %v365_v26 = vld [vmem:[%s4744_s15 + $0xf8] sm:$0xff]  ;;  %v459_v31 = vmul.f32 %v357_v41, %v357_v41 }
  0x35   : > { %v502_v15 = vadd.f32 %v501_v5, %v500_v9  ;;  %v428_v34 = vsel %vm366_vm0, %v365_v26, 0.0  ;;  %v525_v0 = vsel %vm366_vm0, %v465_v53, 0.0 }
  0x36   : > { %v407_v42 = vadd.f32 %v406_v33, %v405_v36  ;;  %v511_v36 = vsel %vm366_vm0, %v458_v24, 0.0  ;;  %v513_v40 = vsel %vm366_vm0, %v459_v31, 0.0  ;;  %v689_v24 = vld [vmem:[%s5832_s2] sm:$0x1] }
  0x37   : > { %v504_v21 = vadd.f32 %v503_v11, %v502_v15 }
  0x38   : > { %v409_v48 = vadd.f32 %v408_v39, %v407_v42 }
  0x39   : > { %v506_v27 = vadd.f32 %v505_v19, %v504_v21  ;;  %v694_v21 = vld [vmem:[%s325_s21] sm:$0x1] }
  0x3a   : > { %v411_v54 = vadd.f32 %v410_v44, %v409_v48  ;;  %v515_v44 = vsel %vm366_vm0, %v460_v30, 0.0  ;;  %v517_v48 = vsel %vm366_vm0, %v461_v35, 0.0 }
  0x3b   : > { %v508_v29 = vadd.f32 %v507_v25, %v506_v27  ;;  %v695_v25 = vadd.f32 1.0, %v694_v21 }
  0x3c   : > { %v413_v60 = vadd.f32 %v412_v50, %v411_v54 }
  0x3d   : > { %v510_v39 = vadd.f32 %v509_v32, %v508_v29 }
  0x3e   : > { %v415_v2 = vadd.f32 %v414_v56, %v413_v60 }
  0x3f   : > { %v512_v42 = vadd.f32 %v511_v36, %v510_v39 }
  0x40   : > { %v417_v8 = vadd.f32 %v416_v62, %v415_v2  ;;  %v467_v62 = vmul.f32 %v365_v26, %v365_v26  ;;  %v527_v2 = vsel %vm366_vm0, %v466_v57, 0.0 }
  0x41   : > { %v514_v46 = vadd.f32 %v513_v40, %v512_v42 }
  0x42   : > { %v419_v14 = vadd.f32 %v418_v4, %v417_v8  ;;  %v529_v4 = vsel %vm366_vm0, %v467_v62, 0.0 }
  0x43   : > { %v516_v50 = vadd.f32 %v515_v44, %v514_v46 }
  0x44   : > { %v421_v20 = vadd.f32 %v420_v10, %v419_v14 }
  0x45   : > { %v518_v54 = vadd.f32 %v517_v48, %v516_v50 }
  0x46   : > { %v423_v23 = vadd.f32 %v422_v16, %v421_v20  ;;  %v700_v20 = vlaneseq }
  0x47   : > { %v520_v58 = vadd.f32 %v519_v52, %v518_v54 }
  0x48   : > { %v425_v33 = vadd.f32 %v424_v22, %v423_v23  ;;  %v701_v22 = vshrl.u32 %v700_v20, 7 }
  0x49   : > { %v522_v61 = vadd.f32 %v521_v55, %v520_v58 }
  0x4a   : > { %v427_v37 = vadd.f32 %v426_v28, %v425_v33  ;;  %v702_v27 = vsub.s32 0, %v701_v22  ;;  %v691_v28 = vld [vmem:[%s5833_s3] sm:$0x1] }
  0x4b   : > { %v524_v1 = vadd.f32 %v523_v59, %v522_v61 }
  0x4c   : > { %v429_v38 = vadd.f32 %v428_v34, %v427_v37  ;;  %v696_v34 = vld [vmem:[%s328_s30] sm:$0x1] }
  0x4d   : > { %v526_v3 = vadd.f32 %v525_v0, %v524_v1 }
  0x4e   : > { %v430_v41 = vrot.slane %v429_v38, 4 }
  0x4f   : > { %v528_v6 = vadd.f32 %v527_v2, %v526_v3 }
  0x50   : > { %v431_v49 = vadd.f32 %v430_v41, %v429_v38 }
  0x51   : > { %v530_v5 = vadd.f32 %v529_v4, %v528_v6 }
  0x52   : > { %v432_v51 = vrot.slane %v431_v49, 2 }
  0x53   : > { %v531_v7 = vrot.slane %v530_v5, 4 }
  0x54   : > { %v433_v56 = vadd.f32 %v432_v51, %v431_v49 }
  0x55   : > { %v532_v8 = vadd.f32 %v531_v7, %v530_v5 }
  0x56   : > { %v434_v60 = vrot.slane %v433_v56, 1 }
  0x57   : > { %v533_v9 = vrot.slane %v532_v8, 2 }
  0x58   : > { %v435_v63 = vadd.f32 %v434_v60, %v433_v56 }
  0x59   : > { %v534_v10 = vadd.f32 %v533_v9, %v532_v8 }
  0x5a   : > { %4229 = vmatmul.mubr.msk.f32.vlgmr.msra.gmra.mxu0 %vm366_vm0, %v435_v63 }
  0x5b   : > { %v535_v12 = vrot.slane %v534_v10, 1 }
  0x5d   : > { %v536_v11 = vadd.f32 %v535_v12, %v534_v10 }
  0x5f   : > { %4236 = vmatmul.mubr.msk.f32.vlgmr.msra.gmra.mxu1 %vm366_vm0, %v536_v11 }
 0x11a   : > { %v608_v13 = vpop.f32.mrf.mxu0 }
 0x11b   : > { %v685_v15 = vmul.f32 %v608_v13, %v608_v13 }
 0x11c   : > { %v4230_v14 = vpop.f32.mrf.mxu0 }
 0x11f   : > { %v681_v16 = vpop.f32.mrf.mxu1 }
 0x120   : > { %v686_v18 = vsub.f32 %v681_v16, %v685_v15 }
 0x121   : > { %v4237_v19 = vpop.f32.mrf.mxu1 }
 0x122   : > { %v687_v17 = vadd.f32 1e-05, %v686_v18 }
 0x124   : > { %4628 = vrsqrt.f32 %v687_v17 }
 0x131   : > { %v4629_v26 = vpop.eup %4628 }
 0x132   : > { %v690_v23 = vmul.f32 %v4629_v26, %v689_v24 }
 0x134   : > { %v692_v31 = vmul.f32 %v690_v23, %v608_v13  ;;  %v697_v32 = vmul.f32 %v695_v25, %v690_v23 }
 0x136   : > { %v693_v33 = vsub.f32 %v691_v28, %v692_v31  ;;  %v703_v29 = vrot.slane %v697_v32, %v702_v27 }
 0x138   : > { %v698_v30 = vmul.f32 %v695_v25, %v693_v33 }
 0x13a   : > { %v699_v36 = vadd.f32 %v698_v30, %v696_v34 }
 0x13c   : > { %v708_v37 = vrot.slane %v699_v36, %v702_v27 }
 0x13d LB: >> { %s3550_s10 = sshll.u32 %s4656_s9, 4  ;;  %s3462_s28 = smul.u32 24, %s4656_s9  ;;  %vm747_vm2 = vcmask 1040384   ;;  %s4656_s9 = sphi %s4863_s9, %s724_s9  }
 0x13e   : >> { %s726_s11 = scalar_lea.vmem %s4744_s15, %s3550_s10  ;;  %s724_s9 = sadd.s32 1, %s4656_s9  }
 0x13f   : >> { %v727_v39 = vld [vmem:[%s726_s11] sm:$0xff]  ;;  %v728_v35 = vld [vmem:[%s726_s11 + $0x8] sm:$0xff]  ;;  %s3463_s12 = scalar_lea.vmem [#allocation2], %s3462_s28  ;;  %p721_p4 = scmp.ge.s32.totalorder %s724_s9, 16  }
 0x140   : >> { %v729_v40 = vmul.f32 %v727_v39, %v703_v29  ;;  %v730_v38 = vmul.f32 %v728_v35, %v703_v29  ;;  %v4880_v60 = vld [vmem:[%s5837_s7] ss:$0 sm:$0xff] (%p721_p4)  ;;  %s4882_s16 = smov (%p721_p4), 0  }
 0x141   : > { %5847 = vst [vmem:[#allocation3_spill] sm:$0xff] (%p721_p4), %v4880_v60 }
 0x142   : >> { %v731_v42 = vadd.f32 %v729_v40, %v708_v37  ;;  %v732_v43 = vadd.f32 %v730_v38, %v708_v37 }
 0x144   : >> { %v733_v44 = vsub.f32 0.0, %v731_v42  ;;  %v734_v41 = vsub.f32 0.0, %v732_v43 }
 0x146   : >> { %v735_v46 = vmul.f32 1.442695, %v733_v44  ;;  %v737_v45 = vmul.f32 1.442695, %v734_v41 }
 0x148   : >> { %4630 = vpow2.f32 %v735_v46 }
 0x149   : >> { %4632 = vpow2.f32 %v737_v45 }
 0x155   : >> { %v4631_v48 = vpop.eup %4630 }
 0x156   : >> { %v4633_v49 = vpop.eup %4632  ;;  %v739_v50 = vadd.f32 1.0, %v4631_v48 }
 0x157   : >> { %v740_v47 = vadd.f32 1.0, %v4633_v49 }
 0x158   : >> { %4634 = vrcp.f32 %v739_v50 }
 0x159   : >> { %4636 = vrcp.f32 %v740_v47 }
 0x165   : >> { %v4635_v52 = vpop.eup %4634 }
 0x166   : >> { %v4637_v51 = vpop.eup %4636  ;;  %v743_v54 = vmul.f32 %v4635_v52, %v731_v42 }
 0x167   : >> { %v744_v53 = vmul.f32 %v4637_v51, %v732_v43 }
 0x168   : >> { %v748_v55 = vrot.slane %v743_v54, 7  ;;  %723 = sbr.rel (!%p721_p4) target bundleno = 317 (0x13d), region = 122 }
 0x169   : >> { %v749_v56 = vrot.slane %v744_v53, 7 }
 0x16a   : >> { %v754_v58 = vsel %vm747_vm2, 0.0, %v748_v55 }
 0x16b   : >> { %3551 = vst.msk [vmem:[%s3463_s12 + $0x18] sm:$0xff] %vm366_vm0, %v754_v58  ;;  %v750_v57 = vsel %vm747_vm2, %v748_v55, %v749_v56  ;;  %v755_v59 = vsel %vm747_vm2, %v749_v56, 0.0 }
 0x16c   : >> { %3552 = vst.msk [vmem:[%s3463_s12 + $0x20] sm:$0xff] %vm366_vm0, %v750_v57  ;;  %3553 = vst.msk [vmem:[%s3463_s12 + $0x28] sm:$0xff] %vm366_vm0, %v755_v59 }
 0x16d LB: >> { %v3579_v61 = vld [vmem:[%s5836_s6 + $0x18] sm:$0xff]  ;;  %v3578_v62 = vld [vmem:[%s5836_s6 + $0x10] sm:$0xff]  ;;  %s769_s15 = smul.u32 192, %s4660_s16  ;;  %v796_v0 = vld [vmem:[%s5836_s6 + $0x8] sm:$0xff]  ;;  %vm3406_vm3 = vcmask 261120   ;;  %s4660_s16 = sphi %s4882_s16, %s768_s16  }
 0x16e   : >> { %4598 = vmatprep.subr.mxu1 %v3579_v61  ;;  %4238 = vmatprep.subr.mxu0 %v3579_v61  ;;  %v3653_v63 = vld [vmem:[%s5836_s6 + $0x28] sm:$0xff]  ;;  %v795_v7 = vld [vmem:[%s5836_s6] sm:$0xff]  ;;  %v3703_v13 = vld [vmem:[%s5836_s6 + $0x38] sm:$0xff] }
 0x16f   : >> { %4600 = vmatpush3.msra.mxu1 %v3579_v61  ;;  %4239 = vmatpush3.msra.mxu0 %v3579_v61  ;;  %s4900_s26 = scalar_lea.vmem [#allocation2], %s769_s15  ;;  %v3652_v8 = vld [vmem:[%s5836_s6 + $0x20] sm:$0xff]  ;;  %v3753_v14 = vld [vmem:[%s5836_s6 + $0x48] sm:$0xff]  ;;  %v3702_v36 = vld [vmem:[%s5836_s6 + $0x30] sm:$0xff] }
 0x170   : >> { %4599 = vmatprep.subr.mxu1 %v3578_v62  ;;  %4240 = vmatprep.subr.mxu0 %v3578_v62  ;;  %v3752_v37 = vld [vmem:[%s5836_s6 + $0x40] sm:$0xff]  ;;  %v5062_v42 = vld [vmem:[%s5836_s6 + $0x58] sm:$0xff]  ;;  %v5067_v43 = vld [vmem:[%s5836_s6 + $0x68] sm:$0xff] }
 0x171   : >> { %4601 = vmatpush3.msra.mxu1 %v3578_v62  ;;  %4241 = vmatpush3.msra.mxu0 %v3578_v62 }
 0x172   : >> { %4278 = vmatprep.subr.mxu1 %v796_v0  ;;  %4318 = vmatprep.subr.mxu0 %v3653_v63 }
 0x173   : >> { %v3554_v1 = vld [vmem:[%s4900_s26 + $0x1] sm:$0xff]  ;;  %v3555_v3 = vld [vmem:[%s4900_s26 + $0x9] sm:$0xff]  ;;  %v3556_v6 = vld [vmem:[%s4900_s26 + $0x11] sm:$0xff] }
 0x174   : >> { %v4904_v2 = vld [vmem:[%s4900_s26 + $0x61] sm:$0xff]  ;;  %4242 = vmatprep.mubr.msk.f32.mxu0 %vm366_vm0, %v3554_v1  ;;  %v4911_v4 = vld [vmem:[%s4900_s26 + $0x69] sm:$0xff]  ;;  %v4915_v5 = vld [vmem:[%s4900_s26 + $0x71] sm:$0xff] }
 0x175   : >> { %4260 = vmatprep.mubr.msk.f32.mxu1 %vm366_vm0, %v4904_v2  ;;  %4243 = vmatmul.mubr.msk.f32.vlgmr.msra.gmra.mxu0 %vm366_vm0, %v3555_v3  ;;  %v4927_v9 = vld [vmem:[%s4900_s26 + $0x19] sm:$0xff]  ;;  %v4936_v12 = vld [vmem:[%s4900_s26 + $0x21] sm:$0xff]  ;;  %v4956_v15 = vld [vmem:[%s4900_s26 + $0x29] sm:$0xff] }
 0x176   : >> { %4261 = vmatmul.mubr.msk.f32.vlgmr.msra.gmra.mxu1 %vm366_vm0, %v4911_v4  ;;  %4319 = vmatpush3.msra.mxu0 %v3653_v63  ;;  %v4930_v10 = vld [vmem:[%s4900_s26 + $0x79] sm:$0xff]  ;;  %v4939_v11 = vld [vmem:[%s4900_s26 + $0x81] sm:$0xff]  ;;  %v4959_v16 = vld [vmem:[%s4900_s26 + $0x89] sm:$0xff] }
 0x177   : >> { %4279 = vmatpush3.msra.mxu1 %v796_v0  ;;  %4245 = vmatprep.mubr.msk.f32.mxu0 %vm366_vm0, %v3556_v6  ;;  %v4962_v18 = vld [vmem:[%s4900_s26 + $0x31] sm:$0xff]  ;;  %v4976_v17 = vld [vmem:[%s4900_s26 + $0x39] sm:$0xff]  ;;  %v4982_v21 = vld [vmem:[%s4900_s26 + $0x41] sm:$0xff] }
 0x178   : >> { %4263 = vmatprep.mubr.msk.f32.mxu1 %vm366_vm0, %v4915_v5  ;;  %4280 = vmatprep.subr.mxu1 %v795_v7  ;;  %v4965_v19 = vld [vmem:[%s4900_s26 + $0x91] sm:$0xff]  ;;  %v4979_v20 = vld [vmem:[%s4900_s26 + $0x99] sm:$0xff]  ;;  %v4985_v22 = vld [vmem:[%s4900_s26 + $0xa1] sm:$0xff] }
 0x179   : >> { %4320 = vmatprep.subr.mxu0 %v3652_v8  ;;  %4246 = vmatmul.mubr.msk.f32.gmra.mxu0 %vm366_vm0, %v4927_v9  ;;  %v4996_v24 = vld [vmem:[%s4900_s26 + $0x49] sm:$0xff]  ;;  %v5002_v26 = vld [vmem:[%s4900_s26 + $0x51] sm:$0xff]  ;;  %v5016_v27 = vld [vmem:[%s4900_s26 + $0x59] sm:$0xff] }
 0x17a   : >> { %4264 = vmatmul.mubr.msk.f32.gmra.mxu1 %vm366_vm0, %v4930_v10  ;;  %4248 = vmatprep.mubr.msk.f32.mxu0 %vm366_vm0, %v4936_v12  ;;  %v4999_v25 = vld [vmem:[%s4900_s26 + $0xa9] sm:$0xff]  ;;  %v5005_v23 = vld [vmem:[%s4900_s26 + $0xb1] sm:$0xff]  ;;  %v5019_v28 = vld [vmem:[%s4900_s26 + $0xb9] sm:$0xff] }
 0x17b   : >> { %4266 = vmatprep.mubr.msk.f32.mxu1 %vm366_vm0, %v4939_v11  ;;  %4281 = vmatpush3.msra.mxu1 %v795_v7  ;;  %v771_v31 = vld [vmem:[%s4900_s26] sm:$0xff]  ;;  %v772_v33 = vld [vmem:[%s4900_s26 + $0x8] sm:$0xff]  ;;  %v773_v34 = vld [vmem:[%s4900_s26 + $0x10] sm:$0xff] }
 0x17c   : >> { %4321 = vmatpush3.msra.mxu0 %v3652_v8  ;;  %4358 = vmatprep.subr.mxu1 %v3703_v13  ;;  %v3628_v32 = vld [vmem:[%s4900_s26 + $0x2] sm:$0xff]  ;;  %v3629_v29 = vld [vmem:[%s4900_s26 + $0xa] sm:$0xff]  ;;  %v3630_v30 = vld [vmem:[%s4900_s26 + $0x12] sm:$0xff] }
 0x17d   : >> { %4398 = vmatprep.subr.mxu0 %v3753_v14  ;;  %4249 = vmatmul.mubr.msk.f32.gmra.mxu0 %vm366_vm0, %v4956_v15  ;;  %v5042_v39 = vld [vmem:[%s4900_s26 + $0x18] sm:$0xff]  ;;  %v5050_v40 = vld [vmem:[%s4900_s26 + $0x20] sm:$0xff]  ;;  %v5074_v44 = vld [vmem:[%s4900_s26 + $0x28] sm:$0xff] }
 0x17e   : >> { %4267 = vmatmul.mubr.msk.f32.gmra.mxu1 %vm366_vm0, %v4959_v16  ;;  %4251 = vmatprep.mubr.msk.f32.mxu0 %vm366_vm0, %v4962_v18  ;;  %v5045_v35 = vld [vmem:[%s4900_s26 + $0x1a] sm:$0xff]  ;;  %v5053_v38 = vld [vmem:[%s4900_s26 + $0x22] sm:$0xff]  ;;  %v5077_v41 = vld [vmem:[%s4900_s26 + $0x2a] sm:$0xff] }
 0x17f   : >> { %4269 = vmatprep.mubr.msk.f32.mxu1 %vm366_vm0, %v4965_v19  ;;  %v5080_v46 = vld [vmem:[%s4900_s26 + $0x30] sm:$0xff]  ;;  %v5096_v48 = vld [vmem:[%s4900_s26 + $0x38] sm:$0xff]  ;;  %v5102_v50 = vld [vmem:[%s4900_s26 + $0x40] sm:$0xff] }
 0x180   : >> { %v5083_v45 = vld [vmem:[%s4900_s26 + $0x32] sm:$0xff]  ;;  %v5099_v49 = vld [vmem:[%s4900_s26 + $0x3a] sm:$0xff]  ;;  %v5105_v47 = vld [vmem:[%s4900_s26 + $0x42] sm:$0xff] }
 0x181   : >> { %4252 = vmatmul.mubr.msk.f32.gmra.mxu0 %vm366_vm0, %v4976_v17  ;;  %v5116_v52 = vld [vmem:[%s4900_s26 + $0x48] sm:$0xff]  ;;  %v5122_v54 = vld [vmem:[%s4900_s26 + $0x50] sm:$0xff]  ;;  %v5136_v55 = vld [vmem:[%s4900_s26 + $0x58] sm:$0xff] }
 0x182   : >> { %4270 = vmatmul.mubr.msk.f32.gmra.mxu1 %vm366_vm0, %v4979_v20  ;;  %4254 = vmatprep.mubr.msk.f32.mxu0 %vm366_vm0, %v4982_v21  ;;  %v5119_v51 = vld [vmem:[%s4900_s26 + $0x4a] sm:$0xff]  ;;  %v5125_v53 = vld [vmem:[%s4900_s26 + $0x52] sm:$0xff]  ;;  %v5139_v56 = vld [vmem:[%s4900_s26 + $0x5a] sm:$0xff] }
 0x183   : >> { %4272 = vmatprep.mubr.msk.f32.mxu1 %vm366_vm0, %v4985_v22  ;;  %v5142_v58 = vld [vmem:[%s4900_s26 + $0x60] sm:$0xff]  ;;  %v5156_v59 = vld [vmem:[%s4900_s26 + $0x68] sm:$0xff]  ;;  %v5162_v62 = vld [vmem:[%s4900_s26 + $0x70] sm:$0xff] }
 0x184   : >> { %v5145_v57 = vld [vmem:[%s4900_s26 + $0x62] sm:$0xff]  ;;  %v5159_v61 = vld [vmem:[%s4900_s26 + $0x6a] sm:$0xff]  ;;  %v5165_v0 = vld [vmem:[%s4900_s26 + $0x72] sm:$0xff] }
 0x185   : >> { %4255 = vmatmul.mubr.msk.f32.gmra.mxu0 %vm366_vm0, %v4996_v24  ;;  %v5176_v63 = vld [vmem:[%s4900_s26 + $0x78] sm:$0xff]  ;;  %v5182_v3 = vld [vmem:[%s4900_s26 + $0x80] sm:$0xff]  ;;  %v5196_v7 = vld [vmem:[%s4900_s26 + $0x88] sm:$0xff] }
 0x186   : >> { %4273 = vmatmul.mubr.msk.f32.gmra.mxu1 %vm366_vm0, %v4999_v25  ;;  %4257 = vmatprep.mubr.msk.f32.mxu0 %vm366_vm0, %v5002_v26  ;;  %v5179_v1 = vld [vmem:[%s4900_s26 + $0x7a] sm:$0xff]  ;;  %v5185_v6 = vld [vmem:[%s4900_s26 + $0x82] sm:$0xff]  ;;  %v5199_v8 = vld [vmem:[%s4900_s26 + $0x8a] sm:$0xff] }
 0x187   : >> { %4275 = vmatprep.mubr.msk.f32.mxu1 %vm366_vm0, %v5005_v23  ;;  %v5256_v60 = vld [vmem:[%s4900_s26 + $0xb8] sm:$0xff] }
 0x189   : >> { %4258 = vmatmul.mubr.msk.f32.gmra.mxu0 %vm366_vm0, %v5016_v27 }
 0x18a   : >> { %4276 = vmatmul.mubr.msk.f32.gmra.mxu1 %vm366_vm0, %v5019_v28  ;;  %4322 = vmatprep.mubr.msk.f32.mxu0 %vm366_vm0, %v3628_v32  ;;  %v5219_v32 = vld [vmem:[%s4900_s26 + $0x9a] sm:$0xff] }
 0x18b   : >> { %4282 = vmatprep.mubr.msk.f32.mxu1 %vm366_vm0, %v771_v31  ;;  %v5216_v31 = vld [vmem:[%s4900_s26 + $0x98] sm:$0xff] }
 0x18d   : >> { %4323 = vmatmul.mubr.msk.f32.vlgmr.msra.gmra.mxu0 %vm366_vm0, %v3629_v29  ;;  %v5225_v29 = vld [vmem:[%s4900_s26 + $0xa2] sm:$0xff] }
 0x18e   : >> { %4283 = vmatmul.mubr.msk.f32.vlgmr.msra.gmra.mxu1 %vm366_vm0, %v772_v33  ;;  %4399 = vmatpush3.msra.mxu0 %v3753_v14  ;;  %v5205_v14 = vld [vmem:[%s4900_s26 + $0x92] sm:$0xff]  ;;  %v5222_v33 = vld [vmem:[%s4900_s26 + $0xa0] sm:$0xff]  ;;  %5848 = vst [vmem:[#allocation4_spill] sm:$0xff] %v5225_v29 }
 0x18f   : >> { %4359 = vmatpush3.msra.mxu1 %v3703_v13  ;;  %4285 = vmatprep.mubr.msk.f32.mxu1 %vm366_vm0, %v773_v34  ;;  %v5202_v13 = vld [vmem:[%s4900_s26 + $0x90] sm:$0xff]  ;;  %v5236_v34 = vld [vmem:[%s4900_s26 + $0xa8] sm:$0xff] }
 0x190   : >> { %4325 = vmatprep.mubr.msk.f32.mxu0 %vm366_vm0, %v3630_v30  ;;  %4360 = vmatprep.subr.mxu1 %v3702_v36  ;;  %v5239_v30 = vld [vmem:[%s4900_s26 + $0xaa] sm:$0xff] }
 0x191   : >> { %4400 = vmatprep.subr.mxu0 %v3752_v37  ;;  %4326 = vmatmul.mubr.msk.f32.gmra.mxu0 %vm366_vm0, %v5045_v35 }
 0x192   : >> { %4286 = vmatmul.mubr.msk.f32.gmra.mxu1 %vm366_vm0, %v5042_v39  ;;  %4328 = vmatprep.mubr.msk.f32.mxu0 %vm366_vm0, %v5053_v38 }
 0x193   : >> { %4288 = vmatprep.mubr.msk.f32.mxu1 %vm366_vm0, %v5050_v40  ;;  %4361 = vmatpush3.msra.mxu1 %v3702_v36  ;;  %v5242_v36 = vld [vmem:[%s4900_s26 + $0xb0] sm:$0xff] }
 0x194   : >> { %4401 = vmatpush3.msra.mxu0 %v3752_v37  ;;  %4438 = vmatprep.subr.mxu1 %v5062_v42  ;;  %v5245_v37 = vld [vmem:[%s4900_s26 + $0xb2] sm:$0xff] }
 0x195   : >> { %4478 = vmatprep.subr.mxu0 %v5067_v43  ;;  %4329 = vmatmul.mubr.msk.f32.gmra.mxu0 %vm366_vm0, %v5077_v41  ;;  %5849 = vst [vmem:[#allocation5_spill] sm:$0xff] %v5245_v37 }
 0x196   : >> { %4289 = vmatmul.mubr.msk.f32.gmra.mxu1 %vm366_vm0, %v5074_v44  ;;  %4331 = vmatprep.mubr.msk.f32.mxu0 %vm366_vm0, %v5083_v45 }
 0x197   : >> { %4291 = vmatprep.mubr.msk.f32.mxu1 %vm366_vm0, %v5080_v46 }
 0x199   : >> { %4332 = vmatmul.mubr.msk.f32.gmra.mxu0 %vm366_vm0, %v5099_v49 }
 0x19a   : >> { %4292 = vmatmul.mubr.msk.f32.gmra.mxu1 %vm366_vm0, %v5096_v48  ;;  %4334 = vmatprep.mubr.msk.f32.mxu0 %vm366_vm0, %v5105_v47 }
 0x19b   : >> { %4294 = vmatprep.mubr.msk.f32.mxu1 %vm366_vm0, %v5102_v50 }
 0x19d   : >> { %4335 = vmatmul.mubr.msk.f32.gmra.mxu0 %vm366_vm0, %v5119_v51 }
 0x19e   : >> { %4295 = vmatmul.mubr.msk.f32.gmra.mxu1 %vm366_vm0, %v5116_v52  ;;  %4337 = vmatprep.mubr.msk.f32.mxu0 %vm366_vm0, %v5125_v53 }
 0x19f   : >> { %4297 = vmatprep.mubr.msk.f32.mxu1 %vm366_vm0, %v5122_v54 }
 0x1a1   : >> { %4338 = vmatmul.mubr.msk.f32.gmra.mxu0 %vm366_vm0, %v5139_v56 }
 0x1a2   : >> { %4298 = vmatmul.mubr.msk.f32.gmra.mxu1 %vm366_vm0, %v5136_v55  ;;  %4340 = vmatprep.mubr.msk.f32.mxu0 %vm366_vm0, %v5145_v57 }
 0x1a3   : >> { %4300 = vmatprep.mubr.msk.f32.mxu1 %vm366_vm0, %v5142_v58 }
 0x1a5   : >> { %4341 = vmatmul.mubr.msk.f32.gmra.mxu0 %vm366_vm0, %v5159_v61 }
 0x1a6   : >> { %4301 = vmatmul.mubr.msk.f32.gmra.mxu1 %vm366_vm0, %v5156_v59  ;;  %4343 = vmatprep.mubr.msk.f32.mxu0 %vm366_vm0, %v5165_v0 }
 0x1a7   : >> { %4303 = vmatprep.mubr.msk.f32.mxu1 %vm366_vm0, %v5162_v62 }
 0x1a9   : >> { %4344 = vmatmul.mubr.msk.f32.gmra.mxu0 %vm366_vm0, %v5179_v1 }
 0x1aa   : >> { %4304 = vmatmul.mubr.msk.f32.gmra.mxu1 %vm366_vm0, %v5176_v63  ;;  %4346 = vmatprep.mubr.msk.f32.mxu0 %vm366_vm0, %v5185_v6 }
 0x1ab   : >> { %4306 = vmatprep.mubr.msk.f32.mxu1 %vm366_vm0, %v5182_v3 }
 0x1ad   : >> { %4347 = vmatmul.mubr.msk.f32.gmra.mxu0 %vm366_vm0, %v5199_v8 }
 0x1ae   : >> { %4307 = vmatmul.mubr.msk.f32.gmra.mxu1 %vm366_vm0, %v5196_v7  ;;  %4349 = vmatprep.mubr.msk.f32.mxu0 %vm366_vm0, %v5205_v14 }
 0x1af   : >> { %4309 = vmatprep.mubr.msk.f32.mxu1 %vm366_vm0, %v5202_v13 }
 0x1b1   : >> { %4350 = vmatmul.mubr.msk.f32.gmra.mxu0 %vm366_vm0, %v5219_v32 }
 0x1b2   : >> { %4310 = vmatmul.mubr.msk.f32.gmra.mxu1 %vm366_vm0, %v5216_v31  ;;  %4352 = vmatprep.mubr.msk.f32.mxu0 %vm366_vm0, %v5225_v29  ;;  %v5259_v29 = vld [vmem:[%s4900_s26 + $0xba] sm:$0xff] }
 0x1b3   : >> { %4312 = vmatprep.mubr.msk.f32.mxu1 %vm366_vm0, %v5222_v33  ;;  %5850 = vst [vmem:[#allocation6_spill] sm:$0xff] %v5259_v29 }
 0x1b5   : >> { %4353 = vmatmul.mubr.msk.f32.gmra.mxu0 %vm366_vm0, %v5239_v30 }
 0x1b6   : >> { %4313 = vmatmul.mubr.msk.f32.gmra.mxu1 %vm366_vm0, %v5236_v34  ;;  %4355 = vmatprep.mubr.msk.f32.mxu0 %vm366_vm0, %v5245_v37  ;;  %v3802_v37 = vld [vmem:[%s5836_s6 + $0x50] sm:$0xff] }
 0x1b7   : >> { %4315 = vmatprep.mubr.msk.f32.mxu1 %vm366_vm0, %v5242_v36 }
 0x1b9   : >> { %4356 = vmatmul.mubr.msk.f32.gmra.mxu0 %vm366_vm0, %v5259_v29  ;;  %v3852_v29 = vld [vmem:[%s5836_s6 + $0x60] sm:$0xff] }
 0x1ba   : >> { %4316 = vmatmul.mubr.msk.f32.gmra.mxu1 %vm366_vm0, %v5256_v60  ;;  %4402 = vmatprep.mubr.msk.f32.mxu0 %vm366_vm0, %v4927_v9  ;;  %v3903_v9 = vld [vmem:[%s5836_s6 + $0x78] sm:$0xff] }
 0x1bb   : >> { %4362 = vmatprep.mubr.msk.f32.mxu1 %vm366_vm0, %v5042_v39  ;;  %v5365_v39 = vld [vmem:[%s4900_s26 + $0xc1] sm:$0xff] }
 0x1bd   : >> { %4403 = vmatmul.mubr.msk.f32.vlgmr.msra.gmra.mxu0 %vm366_vm0, %v4936_v12  ;;  %v3953_v12 = vld [vmem:[%s5836_s6 + $0x88] sm:$0xff] }
 0x1be   : >> { %4363 = vmatmul.mubr.msk.f32.vlgmr.msra.gmra.mxu1 %vm366_vm0, %v5050_v40  ;;  %4479 = vmatpush3.msra.mxu0 %v5067_v43  ;;  %v3700_v40 = vld [vmem:[%s4900_s26 + $0xc8] sm:$0xff]  ;;  %v3701_v43 = vld [vmem:[%s4900_s26 + $0xd0] sm:$0xff] }
 0x1bf   : >> { %4439 = vmatpush3.msra.mxu1 %v5062_v42  ;;  %4365 = vmatprep.mubr.msk.f32.mxu1 %vm366_vm0, %v5074_v44  ;;  %v5369_v42 = vld [vmem:[%s4900_s26 + $0xc9] sm:$0xff]  ;;  %v5379_v44 = vld [vmem:[%s4900_s26 + $0xd1] sm:$0xff] }
 0x1c0   : >> { %4405 = vmatprep.mubr.msk.f32.mxu0 %vm366_vm0, %v4956_v15  ;;  %4440 = vmatprep.subr.mxu1 %v3802_v37  ;;  %v3699_v15 = vld [vmem:[%s4900_s26 + $0xc0] sm:$0xff] }
 0x1c1   : >> { %4480 = vmatprep.subr.mxu0 %v3852_v29  ;;  %4406 = vmatmul.mubr.msk.f32.gmra.mxu0 %vm366_vm0, %v4962_v18 }
 0x1c2   : >> { %4366 = vmatmul.mubr.msk.f32.gmra.mxu1 %vm366_vm0, %v5080_v46  ;;  %4408 = vmatprep.mubr.msk.f32.mxu0 %vm366_vm0, %v4976_v17 }
 0x1c3   : >> { %4368 = vmatprep.mubr.msk.f32.mxu1 %vm366_vm0, %v5096_v48  ;;  %4441 = vmatpush3.msra.mxu1 %v3802_v37  ;;  %v3952_v37 = vld [vmem:[%s5836_s6 + $0x80] sm:$0xff] }
 0x1c4   : >> { %4481 = vmatpush3.msra.mxu0 %v3852_v29  ;;  %4518 = vmatprep.subr.mxu1 %v3903_v9  ;;  %v3902_v29 = vld [vmem:[%s5836_s6 + $0x70] sm:$0xff] }
 0x1c5   : >> { %4558 = vmatprep.subr.mxu0 %v3953_v12  ;;  %4409 = vmatmul.mubr.msk.f32.gmra.mxu0 %vm366_vm0, %v4982_v21 }
 0x1c6   : >> { %4369 = vmatmul.mubr.msk.f32.gmra.mxu1 %vm366_vm0, %v5102_v50  ;;  %4411 = vmatprep.mubr.msk.f32.mxu0 %vm366_vm0, %v4996_v24 }
 0x1c7   : >> { %4371 = vmatprep.mubr.msk.f32.mxu1 %vm366_vm0, %v5116_v52 }
 0x1c9   : >> { %4412 = vmatmul.mubr.msk.f32.gmra.mxu0 %vm366_vm0, %v5002_v26 }
 0x1ca   : >> { %4372 = vmatmul.mubr.msk.f32.gmra.mxu1 %vm366_vm0, %v5122_v54  ;;  %4414 = vmatprep.mubr.msk.f32.mxu0 %vm366_vm0, %v5016_v27 }
 0x1cb   : >> { %4374 = vmatprep.mubr.msk.f32.mxu1 %vm366_vm0, %v5136_v55 }
 0x1cd   : >> { %4415 = vmatmul.mubr.msk.f32.gmra.mxu0 %vm366_vm0, %v4904_v2 }
 0x1ce   : >> { %4375 = vmatmul.mubr.msk.f32.gmra.mxu1 %vm366_vm0, %v5142_v58  ;;  %4417 = vmatprep.mubr.msk.f32.mxu0 %vm366_vm0, %v4911_v4 }
 0x1cf   : >> { %4377 = vmatprep.mubr.msk.f32.mxu1 %vm366_vm0, %v5156_v59 }
 0x1d1   : >> { %4418 = vmatmul.mubr.msk.f32.gmra.mxu0 %vm366_vm0, %v4915_v5 }
 0x1d2   : >> { %4378 = vmatmul.mubr.msk.f32.gmra.mxu1 %vm366_vm0, %v5162_v62  ;;  %4420 = vmatprep.mubr.msk.f32.mxu0 %vm366_vm0, %v4930_v10 }
 0x1d3   : >> { %4380 = vmatprep.mubr.msk.f32.mxu1 %vm366_vm0, %v5176_v63 }
 0x1d5   : >> { %4421 = vmatmul.mubr.msk.f32.gmra.mxu0 %vm366_vm0, %v4939_v11 }
 0x1d6   : >> { %4381 = vmatmul.mubr.msk.f32.gmra.mxu1 %vm366_vm0, %v5182_v3  ;;  %4423 = vmatprep.mubr.msk.f32.mxu0 %vm366_vm0, %v4959_v16 }
 0x1d7   : >> { %4383 = vmatprep.mubr.msk.f32.mxu1 %vm366_vm0, %v5196_v7 }
 0x1d9   : >> { %4424 = vmatmul.mubr.msk.f32.gmra.mxu0 %vm366_vm0, %v4965_v19 }
 0x1da   : >> { %4384 = vmatmul.mubr.msk.f32.gmra.mxu1 %vm366_vm0, %v5202_v13  ;;  %4426 = vmatprep.mubr.msk.f32.mxu0 %vm366_vm0, %v4979_v20 }
 0x1db   : >> { %4386 = vmatprep.mubr.msk.f32.mxu1 %vm366_vm0, %v5216_v31 }
 0x1dd   : >> { %4427 = vmatmul.mubr.msk.f32.gmra.mxu0 %vm366_vm0, %v4985_v22 }
 0x1de   : >> { %4387 = vmatmul.mubr.msk.f32.gmra.mxu1 %vm366_vm0, %v5222_v33  ;;  %4429 = vmatprep.mubr.msk.f32.mxu0 %vm366_vm0, %v4999_v25 }
 0x1df   : >> { %4389 = vmatprep.mubr.msk.f32.mxu1 %vm366_vm0, %v5236_v34 }
 0x1e1   : >> { %4430 = vmatmul.mubr.msk.f32.gmra.mxu0 %vm366_vm0, %v5005_v23 }
 0x1e2   : >> { %4390 = vmatmul.mubr.msk.f32.gmra.mxu1 %vm366_vm0, %v5242_v36  ;;  %4432 = vmatprep.mubr.msk.f32.mxu0 %vm366_vm0, %v5019_v28 }
 0x1e3   : >> { %4392 = vmatprep.mubr.msk.f32.mxu1 %vm366_vm0, %v5256_v60 }
 0x1e5   : >> { %4433 = vmatmul.mubr.msk.f32.gmra.mxu0 %vm366_vm0, %v5365_v39 }
 0x1e6   : >> { %4393 = vmatmul.mubr.msk.f32.gmra.mxu1 %vm366_vm0, %v3699_v15  ;;  %4435 = vmatprep.mubr.msk.f32.mxu0 %vm366_vm0, %v5369_v42 }
 0x1e7   : >> { %4395 = vmatprep.mubr.msk.f32.mxu1 %vm366_vm0, %v3700_v40 }
 0x1e9   : >> { %4436 = vmatmul.mubr.msk.f32.gmra.mxu0 %vm366_vm0, %v5379_v44 }
 0x1ea   : >> { %4396 = vmatmul.mubr.msk.f32.gmra.mxu1 %vm366_vm0, %v3701_v43  ;;  %4482 = vmatprep.mubr.msk.f32.mxu0 %vm366_vm0, %v5080_v46  ;;  %v3799_v46 = vld [vmem:[%s4900_s26 + $0xc2] sm:$0xff] }
 0x1eb   : >> { %4442 = vmatprep.mubr.msk.f32.mxu1 %vm366_vm0, %v5045_v35  ;;  %v5851_v35 = vld [vmem:[#allocation4_spill] sm:$0xff] }
 0x1ed   : >> { %4483 = vmatmul.mubr.msk.f32.vlgmr.msra.gmra.mxu0 %vm366_vm0, %v5096_v48  ;;  %v3849_v48 = vld [vmem:[%s4900_s26 + $0xd8] sm:$0xff] }
 0x1ee   : >> { %4443 = vmatmul.mubr.msk.f32.vlgmr.msra.gmra.mxu1 %vm366_vm0, %v5053_v38  ;;  %4559 = vmatpush3.msra.mxu0 %v3953_v12  ;;  %v5852_v38 = vld [vmem:[#allocation5_spill] sm:$0xff] }
 0x1ef   : >> { %4519 = vmatpush3.msra.mxu1 %v3903_v9  ;;  %4445 = vmatprep.mubr.msk.f32.mxu1 %vm366_vm0, %v5077_v41  ;;  %v5853_v41 = vld [vmem:[#allocation6_spill] sm:$0xff] }
 0x1f0   : >> { %4485 = vmatprep.mubr.msk.f32.mxu0 %vm366_vm0, %v5102_v50  ;;  %4520 = vmatprep.subr.mxu1 %v3902_v29  ;;  %v5474_v50 = vld [vmem:[%s4900_s26 + $0xca] sm:$0xff] }
 0x1f1   : >> { %4560 = vmatprep.subr.mxu0 %v3952_v37  ;;  %4486 = vmatmul.mubr.msk.f32.gmra.mxu0 %vm366_vm0, %v5116_v52  ;;  %v3801_v52 = vld [vmem:[%s4900_s26 + $0xd2] sm:$0xff] }
 0x1f2   : >> { %4446 = vmatmul.mubr.msk.f32.gmra.mxu1 %vm366_vm0, %v5083_v45  ;;  %4488 = vmatprep.mubr.msk.f32.mxu0 %vm366_vm0, %v5122_v54  ;;  %v3851_v54 = vld [vmem:[%s4900_s26 + $0xe8] sm:$0xff] }
 0x1f3   : >> { %4448 = vmatprep.mubr.msk.f32.mxu1 %vm366_vm0, %v5099_v49  ;;  %4521 = vmatpush3.msra.mxu1 %v3902_v29 }
 0x1f4   : >> { %4561 = vmatpush3.msra.mxu0 %v3952_v37 }
 0x1f5   : >> { %4489 = vmatmul.mubr.msk.f32.gmra.mxu0 %vm366_vm0, %v5136_v55  ;;  %v3951_v55 = vld [vmem:[%s4900_s26 + $0xea] sm:$0xff] }
 0x1f6   : >> { %4449 = vmatmul.mubr.msk.f32.gmra.mxu1 %vm366_vm0, %v5105_v47  ;;  %4491 = vmatprep.mubr.msk.f32.mxu0 %vm366_vm0, %v5142_v58 }
 0x1f7   : >> { %4451 = vmatprep.mubr.msk.f32.mxu1 %vm366_vm0, %v5119_v51 }
 0x1f9   : >> { %4492 = vmatmul.mubr.msk.f32.gmra.mxu0 %vm366_vm0, %v5156_v59 }
 0x1fa   : >> { %4452 = vmatmul.mubr.msk.f32.gmra.mxu1 %vm366_vm0, %v5125_v53  ;;  %4494 = vmatprep.mubr.msk.f32.mxu0 %vm366_vm0, %v5162_v62 }
 0x1fb   : >> { %4454 = vmatprep.mubr.msk.f32.mxu1 %vm366_vm0, %v5139_v56 }
 0x1fd   : >> { %4495 = vmatmul.mubr.msk.f32.gmra.mxu0 %vm366_vm0, %v5176_v63 }
 0x1fe   : >> { %4455 = vmatmul.mubr.msk.f32.gmra.mxu1 %vm366_vm0, %v5145_v57  ;;  %4497 = vmatprep.mubr.msk.f32.mxu0 %vm366_vm0, %v5182_v3 }
 0x1ff   : >> { %4457 = vmatprep.mubr.msk.f32.mxu1 %vm366_vm0, %v5159_v61 }
 0x201   : >> { %4498 = vmatmul.mubr.msk.f32.gmra.mxu0 %vm366_vm0, %v5196_v7 }
 0x202   : >> { %4458 = vmatmul.mubr.msk.f32.gmra.mxu1 %vm366_vm0, %v5165_v0  ;;  %4500 = vmatprep.mubr.msk.f32.mxu0 %vm366_vm0, %v5202_v13 }
 0x203   : >> { %4460 = vmatprep.mubr.msk.f32.mxu1 %vm366_vm0, %v5179_v1 }
 0x205   : >> { %4501 = vmatmul.mubr.msk.f32.gmra.mxu0 %vm366_vm0, %v5216_v31 }
 0x206   : >> { %4461 = vmatmul.mubr.msk.f32.gmra.mxu1 %vm366_vm0, %v5185_v6  ;;  %4503 = vmatprep.mubr.msk.f32.mxu0 %vm366_vm0, %v5222_v33 }
 0x207   : >> { %4463 = vmatprep.mubr.msk.f32.mxu1 %vm366_vm0, %v5199_v8 }
 0x209   : >> { %4504 = vmatmul.mubr.msk.f32.gmra.mxu0 %vm366_vm0, %v5236_v34 }
 0x20a   : >> { %4464 = vmatmul.mubr.msk.f32.gmra.mxu1 %vm366_vm0, %v5205_v14  ;;  %4506 = vmatprep.mubr.msk.f32.mxu0 %vm366_vm0, %v5242_v36 }
 0x20b   : >> { %4466 = vmatprep.mubr.msk.f32.mxu1 %vm366_vm0, %v5219_v32 }
 0x20d   : >> { %4507 = vmatmul.mubr.msk.f32.gmra.mxu0 %vm366_vm0, %v5256_v60  ;;  %v3850_v60 = vld [vmem:[%s4900_s26 + $0xe0] sm:$0xff] }
 0x20e   : >> { %4467 = vmatmul.mubr.msk.f32.gmra.mxu1 %vm366_vm0, %v5851_v35  ;;  %4509 = vmatprep.mubr.msk.f32.mxu0 %vm366_vm0, %v3699_v15 }
 0x20f   : >> { %4469 = vmatprep.mubr.msk.f32.mxu1 %vm366_vm0, %v5239_v30 }
 0x211   : >> { %4510 = vmatmul.mubr.msk.f32.gmra.mxu0 %vm366_vm0, %v3700_v40 }
 0x212   : >> { %4470 = vmatmul.mubr.msk.f32.gmra.mxu1 %vm366_vm0, %v5852_v38  ;;  %4512 = vmatprep.mubr.msk.f32.mxu0 %vm366_vm0, %v3701_v43 }
 0x213   : >> { %4472 = vmatprep.mubr.msk.f32.mxu1 %vm366_vm0, %v5853_v41 }
 0x215   : >> { %4513 = vmatmul.mubr.msk.f32.gmra.mxu0 %vm366_vm0, %v3849_v48 }
 0x216   : >> { %4473 = vmatmul.mubr.msk.f32.gmra.mxu1 %vm366_vm0, %v3799_v46  ;;  %4515 = vmatprep.mubr.msk.f32.mxu0 %vm366_vm0, %v3850_v60 }
 0x217   : >> { %4475 = vmatprep.mubr.msk.f32.mxu1 %vm366_vm0, %v5474_v50 }
 0x219   : >> { %4516 = vmatmul.mubr.msk.f32.gmra.mxu0 %vm366_vm0, %v3851_v54 }
 0x21a   : >> { %4476 = vmatmul.mubr.msk.f32.gmra.mxu1 %vm366_vm0, %v3801_v52  ;;  %4562 = vmatprep.mubr.msk.f32.mxu0 %vm366_vm0, %v5083_v45  ;;  %v3900_v45 = vld [vmem:[%s4900_s26 + $0xe1] sm:$0xff] }
 0x21b   : >> { %4522 = vmatprep.mubr.msk.f32.mxu1 %vm366_vm0, %v4962_v18 }
 0x21d   : >> { %4563 = vmatmul.mubr.msk.f32.vlgmr.msra.gmra.mxu0 %vm366_vm0, %v5099_v49  ;;  %v3950_v49 = vld [vmem:[%s4900_s26 + $0xe2] sm:$0xff] }
 0x21e   : >> { %4523 = vmatmul.mubr.msk.f32.vlgmr.msra.gmra.mxu1 %vm366_vm0, %v4976_v17  ;;  %4565 = vmatprep.mubr.msk.f32.mxu0 %vm366_vm0, %v5105_v47 }
 0x21f   : >> { %4525 = vmatprep.mubr.msk.f32.mxu1 %vm366_vm0, %v4982_v21 }
 0x221   : >> { %4566 = vmatmul.mubr.msk.f32.gmra.mxu0 %vm366_vm0, %v5119_v51 }
 0x222   : >> { %4526 = vmatmul.mubr.msk.f32.gmra.mxu1 %vm366_vm0, %v4996_v24  ;;  %4568 = vmatprep.mubr.msk.f32.mxu0 %vm366_vm0, %v5125_v53  ;;  %v3901_v53 = vld [vmem:[%s4900_s26 + $0xe9] sm:$0xff] }
 0x223   : >> { %4528 = vmatprep.mubr.msk.f32.mxu1 %vm366_vm0, %v5002_v26  ;;  %v3899_v26 = vld [vmem:[%s4900_s26 + $0xd9] sm:$0xff] }
 0x225   : >> { %4569 = vmatmul.mubr.msk.f32.gmra.mxu0 %vm366_vm0, %v5139_v56 }
 0x226   : >> { %4529 = vmatmul.mubr.msk.f32.gmra.mxu1 %vm366_vm0, %v5016_v27  ;;  %4571 = vmatprep.mubr.msk.f32.mxu0 %vm366_vm0, %v5145_v57 }
 0x227   : >> { %4531 = vmatprep.mubr.msk.f32.mxu1 %vm366_vm0, %v4904_v2 }
 0x229   : >> { %4572 = vmatmul.mubr.msk.f32.gmra.mxu0 %vm366_vm0, %v5159_v61 }
 0x22a   : >> { %4532 = vmatmul.mubr.msk.f32.gmra.mxu1 %vm366_vm0, %v4911_v4  ;;  %4574 = vmatprep.mubr.msk.f32.mxu0 %vm366_vm0, %v5165_v0 }
 0x22b   : >> { %4534 = vmatprep.mubr.msk.f32.mxu1 %vm366_vm0, %v4915_v5 }
 0x22d   : >> { %4575 = vmatmul.mubr.msk.f32.gmra.mxu0 %vm366_vm0, %v5179_v1 }
 0x22e   : >> { %4535 = vmatmul.mubr.msk.f32.gmra.mxu1 %vm366_vm0, %v4930_v10  ;;  %4577 = vmatprep.mubr.msk.f32.mxu0 %vm366_vm0, %v5185_v6 }
 0x22f   : >> { %4537 = vmatprep.mubr.msk.f32.mxu1 %vm366_vm0, %v4939_v11 }
 0x231   : >> { %4578 = vmatmul.mubr.msk.f32.gmra.mxu0 %vm366_vm0, %v5199_v8 }
 0x232   : >> { %4538 = vmatmul.mubr.msk.f32.gmra.mxu1 %vm366_vm0, %v4959_v16  ;;  %4580 = vmatprep.mubr.msk.f32.mxu0 %vm366_vm0, %v5205_v14 }
 0x233   : >> { %4540 = vmatprep.mubr.msk.f32.mxu1 %vm366_vm0, %v4965_v19 }
 0x235   : >> { %v4244_v2 = vpop.f32.mrf.mxu0  ;;  %4581 = vmatmul.mubr.msk.f32.gmra.mxu0 %vm366_vm0, %v5219_v32 }
 0x236   : >> { %v5538_v4 = vpop.f32.mrf.mxu1  ;;  %4541 = vmatmul.mubr.msk.f32.gmra.mxu1 %vm366_vm0, %v4979_v20  ;;  %4583 = vmatprep.mubr.msk.f32.mxu0 %vm366_vm0, %v5851_v35 }
 0x237   : >> { %4543 = vmatprep.mubr.msk.f32.mxu1 %vm366_vm0, %v4985_v22  ;;  %v964_v5 = vpop.f32.mrf.mxu0 }
 0x238   : >> { %v5548_v10 = vpop.f32.mrf.mxu1 }
 0x239   : >> { %v4247_v11 = vpop.f32.mrf.mxu0  ;;  %4584 = vmatmul.mubr.msk.f32.gmra.mxu0 %vm366_vm0, %v5239_v30 }
 0x23a   : >> { %v5550_v16 = vpop.f32.mrf.mxu1  ;;  %4544 = vmatmul.mubr.msk.f32.gmra.mxu1 %vm366_vm0, %v4999_v25  ;;  %4586 = vmatprep.mubr.msk.f32.mxu0 %vm366_vm0, %v5852_v38 }
 0x23b   : >> { %4546 = vmatprep.mubr.msk.f32.mxu1 %vm366_vm0, %v5005_v23  ;;  %v974_v18 = vpop.f32.mrf.mxu0  ;;  %v3949_v23 = vld [vmem:[%s4900_s26 + $0xda] sm:$0xff]  ;;  %s3979_s26 = sshll.u32 %s4660_s16, 7  ;;  %s768_s16 = sadd.s32 1, %s4660_s16  }
 0x23c   : >> { %v1030_v19 = vpop.f32.mrf.mxu1  ;;  %s5737_s19 = scalar_lea.vmem %s4749_s18, %s3979_s26  ;;  %p765_p5 = scmp.ge.s32.totalorder %s768_s16, 2  }
 0x23d   : >> { %v4250_v17 = vpop.f32.mrf.mxu0  ;;  %4587 = vmatmul.mubr.msk.f32.gmra.mxu0 %vm366_vm0, %v5853_v41 }
 0x23e   : >> { %v4268_v20 = vpop.f32.mrf.mxu1  ;;  %4547 = vmatmul.mubr.msk.f32.gmra.mxu1 %vm366_vm0, %v5019_v28  ;;  %4589 = vmatprep.mubr.msk.f32.mxu0 %vm366_vm0, %v3799_v46 }
 0x23f   : >> { %4549 = vmatprep.mubr.msk.f32.mxu1 %vm366_vm0, %v5365_v39  ;;  %v983_v21 = vpop.f32.mrf.mxu0 }
 0x240   : >> { %v5567_v22 = vpop.f32.mrf.mxu1 }
 0x241   : >> { %v4253_v24 = vpop.f32.mrf.mxu0  ;;  %4590 = vmatmul.mubr.msk.f32.gmra.mxu0 %vm366_vm0, %v5474_v50 }
 0x242   : >> { %v5569_v25 = vpop.f32.mrf.mxu1  ;;  %4550 = vmatmul.mubr.msk.f32.gmra.mxu1 %vm366_vm0, %v5369_v42  ;;  %4592 = vmatprep.mubr.msk.f32.mxu0 %vm366_vm0, %v3801_v52 }
 0x243   : >> { %4552 = vmatprep.mubr.msk.f32.mxu1 %vm366_vm0, %v5379_v44  ;;  %v992_v27 = vpop.f32.mrf.mxu0 }
 0x244   : >> { %v5580_v28 = vpop.f32.mrf.mxu1 }
 0x245   : >> { %v4256_v47 = vpop.f32.mrf.mxu0  ;;  %4593 = vmatmul.mubr.msk.f32.gmra.mxu0 %vm366_vm0, %v3949_v23 }
 0x246   : >> { %v5584_v51 = vpop.f32.mrf.mxu1  ;;  %4553 = vmatmul.mubr.msk.f32.gmra.mxu1 %vm366_vm0, %v3899_v26  ;;  %4595 = vmatprep.mubr.msk.f32.mxu0 %vm366_vm0, %v3950_v49 }
 0x247   : >> { %4555 = vmatprep.mubr.msk.f32.mxu1 %vm366_vm0, %v3900_v45  ;;  %v1002_v56 = vpop.f32.mrf.mxu0 }
 0x248   : >> { %v1058_v58 = vpop.f32.mrf.mxu1 }
 0x249   : >> { %v4259_v57 = vpop.f32.mrf.mxu0  ;;  %4596 = vmatmul.mubr.msk.f32.gmra.mxu0 %vm366_vm0, %v3951_v55 }
 0x24a   : >> { %v4277_v59 = vpop.f32.mrf.mxu1  ;;  %4556 = vmatmul.mubr.msk.f32.gmra.mxu1 %vm366_vm0, %v3901_v53 }
 0x24b   : >> { %v1011_v61 = vpop.f32.mrf.mxu0 }
 0x24c   : >> { %v5594_v62 = vpop.f32.mrf.mxu1 }
 0x24d   : >> { %v4324_v63 = vpop.f32.mrf.mxu0 }
 0x24e   : >> { %v4284_v0 = vpop.f32.mrf.mxu1 }
 0x24f   : >> { %v1219_v1 = vadd.f32 %v4284_v0, %v4244_v2  ;;  %v1491_v6 = vpop.f32.mrf.mxu0 }
 0x250   : >> { %v1213_v3 = vpop.f32.mrf.mxu1 }
 0x251   : >> { %v5596_v7 = vadd.f32 %v4324_v63, %v1219_v1  ;;  %v1214_v8 = vadd.f32 %v1213_v3, %v964_v5  ;;  %v4327_v14 = vpop.f32.mrf.mxu0 }
 0x252   : >> { %v4287_v13 = vpop.f32.mrf.mxu1 }
 0x253   : >> { %v5598_v31 = vadd.f32 %v1491_v6, %v1214_v8  ;;  %v1228_v32 = vadd.f32 %v4287_v13, %v4247_v11  ;;  %v1501_v34 = vpop.f32.mrf.mxu0 }
 0x254   : >> { %v1223_v33 = vpop.f32.mrf.mxu1 }
 0x255   : >> { %v5600_v30 = vadd.f32 %v4327_v14, %v1228_v32  ;;  %v4330_v9 = vpop.f32.mrf.mxu0 }
 0x256   : >> { %v4290_v36 = vpop.f32.mrf.mxu1 }
 0x257   : >> { %v1510_v15 = vpop.f32.mrf.mxu0 }
 0x258   : >> { %v1232_v12 = vpop.f32.mrf.mxu1 }
 0x259   : >> { %v1233_v39 = vadd.f32 %v1232_v12, %v983_v21  ;;  %v4333_v42 = vpop.f32.mrf.mxu0 }
 0x25a   : >> { %v4293_v40 = vpop.f32.mrf.mxu1 }
 0x25b   : >> { %v5602_v43 = vadd.f32 %v1510_v15, %v1233_v39  ;;  %v1247_v44 = vadd.f32 %v4293_v40, %v4253_v24  ;;  %v1519_v37 = vpop.f32.mrf.mxu0 }
 0x25c   : >> { %v1241_v29 = vpop.f32.mrf.mxu1 }
 0x25d   : >> { %v5604_v35 = vadd.f32 %v4333_v42, %v1247_v44  ;;  %v1242_v38 = vadd.f32 %v1241_v29, %v992_v27  ;;  %v4336_v46 = vpop.f32.mrf.mxu0 }
 0x25e   : >> { %v4296_v41 = vpop.f32.mrf.mxu1 }
 0x25f   : >> { %v5606_v48 = vadd.f32 %v1519_v37, %v1242_v38  ;;  %v1256_v50 = vadd.f32 %v4296_v41, %v4256_v47  ;;  %v1529_v52 = vpop.f32.mrf.mxu0 }
 0x260   : >> { %v1251_v60 = vpop.f32.mrf.mxu1 }
 0x261   : >> { %v5608_v54 = vadd.f32 %v4336_v46, %v1256_v50  ;;  %v4339_v5 = vpop.f32.mrf.mxu0 }
 0x262   : >> { %v4299_v2 = vpop.f32.mrf.mxu1 }
 0x263   : >> { %v1538_v18 = vpop.f32.mrf.mxu0 }
 0x264   : >> { %v1260_v11 = vpop.f32.mrf.mxu1 }
 0x265   : >> { %v1261_v19 = vadd.f32 %v1260_v11, %v1011_v61  ;;  %v4342_v20 = vpop.f32.mrf.mxu0 }
 0x266   : >> { %v4302_v17 = vpop.f32.mrf.mxu1 }
 0x267   : >> { %v5610_v21 = vadd.f32 %v1538_v18, %v1261_v19  ;;  %v1275_v24 = vadd.f32 %v4302_v17, %v5538_v4  ;;  %v1547_v23 = vpop.f32.mrf.mxu0 }
 0x268   : >> { %v1269_v26 = vpop.f32.mrf.mxu1 }
 0x269   : >> { %v5613_v27 = vadd.f32 %v4342_v20, %v1275_v24  ;;  %v1270_v45 = vadd.f32 %v1269_v26, %v5548_v10  ;;  %v4345_v47 = vpop.f32.mrf.mxu0 }
 0x26a   : >> { %v4305_v49 = vpop.f32.mrf.mxu1 }
 0x26b   : >> { %v5616_v53 = vadd.f32 %v1547_v23, %v1270_v45  ;;  %v1284_v55 = vadd.f32 %v4305_v49, %v5550_v16  ;;  %v1557_v58 = vpop.f32.mrf.mxu0 }
 0x26c   : >> { %v1279_v56 = vpop.f32.mrf.mxu1 }
 0x26d   : >> { %v5619_v57 = vadd.f32 %v4345_v47, %v1284_v55  ;;  %v4348_v61 = vpop.f32.mrf.mxu0 }
 0x26e   : >> { %v4308_v59 = vpop.f32.mrf.mxu1 }
 0x26f   : >> { %v1566_v4 = vpop.f32.mrf.mxu0 }
 0x270   : >> { %v1288_v0 = vpop.f32.mrf.mxu1 }
 0x271   : >> { %v1289_v63 = vadd.f32 %v1288_v0, %v5567_v22  ;;  %v4351_v3 = vpop.f32.mrf.mxu0 }
 0x272   : >> { %v4311_v1 = vpop.f32.mrf.mxu1 }
 0x273   : >> { %v5622_v6 = vadd.f32 %v1566_v4, %v1289_v63  ;;  %v1303_v10 = vadd.f32 %v4311_v1, %v5569_v25  ;;  %v1575_v13 = vpop.f32.mrf.mxu0 }
 0x274   : >> { %v1297_v8 = vpop.f32.mrf.mxu1 }
 0x275   : >> { %v5625_v14 = vadd.f32 %v4351_v3, %v1303_v10  ;;  %v1298_v16 = vadd.f32 %v1297_v8, %v5580_v28  ;;  %v4354_v33 = vpop.f32.mrf.mxu0 }
 0x276   : >> { %v4314_v32 = vpop.f32.mrf.mxu1 }
 0x277   : >> { %v5628_v34 = vadd.f32 %v1575_v13, %v1298_v16  ;;  %v1312_v36 = vadd.f32 %v4314_v32, %v5584_v51  ;;  %v1585_v22 = vpop.f32.mrf.mxu0 }
 0x278   : >> { %v1307_v9 = vpop.f32.mrf.mxu1 }
 0x279   : >> { %v5631_v12 = vadd.f32 %v4354_v33, %v1312_v36  ;;  %v4357_v39 = vpop.f32.mrf.mxu0 }
 0x27a   : >> { %v4317_v15 = vpop.f32.mrf.mxu1 }
 0x27b   : >> { %v1594_v25 = vpop.f32.mrf.mxu0 }
 0x27c   : >> { %v1316_v40 = vpop.f32.mrf.mxu1 }
 0x27d   : >> { %v1317_v42 = vadd.f32 %v1316_v40, %v5594_v62  ;;  %v4404_v29 = vpop.f32.mrf.mxu0 }
 0x27e   : >> { %v4364_v44 = vpop.f32.mrf.mxu1 }
 0x27f   : >> { %v5634_v37 = vadd.f32 %v1594_v25, %v1317_v42  ;;  %v1897_v28 = vadd.f32 %v4364_v44, %v5596_v7  ;;  %v2079_v41 = vpop.f32.mrf.mxu0 }
 0x280   : >> { %v1785_v38 = vpop.f32.mrf.mxu1 }
 0x281   : >> { %v5637_v46 = vadd.f32 %v4404_v29, %v1897_v28  ;;  %v1896_v51 = vadd.f32 %v1785_v38, %v5598_v31  ;;  %v4407_v60 = vpop.f32.mrf.mxu0 }
 0x282   : >> { %v4367_v50 = vpop.f32.mrf.mxu1 }
 0x283   : >> { %v5640_v52 = vadd.f32 %v2079_v41, %v1896_v51  ;;  %v1898_v2 = vadd.f32 %v4367_v50, %v5600_v30  ;;  %v2089_v62 = vpop.f32.mrf.mxu0 }
 0x284   : >> { %v1795_v5 = vpop.f32.mrf.mxu1 }
 0x285   : >> { %v5643_v11 = vadd.f32 %v4407_v60, %v1898_v2  ;;  %v4410_v19 = vpop.f32.mrf.mxu0 }
 0x286   : >> { %v4370_v18 = vpop.f32.mrf.mxu1 }
 0x287   : >> { %v2098_v7 = vpop.f32.mrf.mxu0 }
 0x288   : >> { %v1804_v17 = vpop.f32.mrf.mxu1 }
 0x289   : >> { %v1899_v20 = vadd.f32 %v1804_v17, %v5602_v43  ;;  %v4413_v26 = vpop.f32.mrf.mxu0 }
 0x28a   : >> { %v4373_v24 = vpop.f32.mrf.mxu1 }
 0x28b   : >> { %v5646_v23 = vadd.f32 %v2098_v7, %v1899_v20  ;;  %v1901_v31 = vadd.f32 %v4373_v24, %v5604_v35  ;;  %v2107_v49 = vpop.f32.mrf.mxu0 }
 0x28c   : >> { %v1813_v45 = vpop.f32.mrf.mxu1 }
 0x28d   : >> { %v5649_v47 = vadd.f32 %v4413_v26, %v1901_v31  ;;  %v1900_v30 = vadd.f32 %v1813_v45, %v5606_v48  ;;  %v4416_v56 = vpop.f32.mrf.mxu0 }
 0x28e   : >> { %v4376_v55 = vpop.f32.mrf.mxu1 }
 0x28f   : >> { %v5652_v58 = vadd.f32 %v2107_v49, %v1900_v30  ;;  %v1902_v59 = vadd.f32 %v4376_v55, %v5608_v54  ;;  %v2117_v43 = vpop.f32.mrf.mxu0 }
 0x290   : >> { %v1823_v61 = vpop.f32.mrf.mxu1 }
 0x291   : >> { %v5655_v0 = vadd.f32 %v4416_v56, %v1902_v59  ;;  %v4419_v63 = vpop.f32.mrf.mxu0 }
 0x292   : >> { %v4379_v4 = vpop.f32.mrf.mxu1 }
 0x293   : >> { %v2126_v35 = vpop.f32.mrf.mxu0 }
 0x294   : >> { %v1832_v1 = vpop.f32.mrf.mxu1 }
 0x295   : >> { %v1903_v3 = vadd.f32 %v1832_v1, %v5610_v21  ;;  %v4422_v8 = vpop.f32.mrf.mxu0 }
 0x296   : >> { %v4382_v10 = vpop.f32.mrf.mxu1 }
 0x297   : >> { %v5658_v13 = vadd.f32 %v2126_v35, %v1903_v3  ;;  %v1905_v48 = vadd.f32 %v4382_v10, %v5613_v27  ;;  %v2135_v32 = vpop.f32.mrf.mxu0 }
 0x298   : >> { %v1841_v16 = vpop.f32.mrf.mxu1 }
 0x299   : >> { %v5661_v33 = vadd.f32 %v4422_v8, %v1905_v48  ;;  %v1904_v54 = vadd.f32 %v1841_v16, %v5616_v53  ;;  %v4425_v9 = vpop.f32.mrf.mxu0 }
 0x29a   : >> { %v4385_v36 = vpop.f32.mrf.mxu1 }
 0x29b   : >> { %v5664_v22 = vadd.f32 %v2135_v32, %v1904_v54  ;;  %v1906_v15 = vadd.f32 %v4385_v36, %v5619_v57  ;;  %v2145_v21 = vpop.f32.mrf.mxu0 }
 0x29c   : >> { %v1851_v39 = vpop.f32.mrf.mxu1 }
 0x29d   : >> { %v5667_v40 = vadd.f32 %v4425_v9, %v1906_v15  ;;  %v4428_v42 = vpop.f32.mrf.mxu0 }
 0x29e   : >> { %v4388_v25 = vpop.f32.mrf.mxu1 }
 0x29f   : >> { %v2154_v27 = vpop.f32.mrf.mxu0 }
 0x2a0   : >> { %v1860_v44 = vpop.f32.mrf.mxu1 }
 0x2a1   : >> { %v1907_v29 = vadd.f32 %v1860_v44, %v5622_v6  ;;  %v4431_v38 = vpop.f32.mrf.mxu0 }
 0x2a2   : >> { %v4391_v28 = vpop.f32.mrf.mxu1 }
 0x2a3   : >> { %v5670_v41 = vadd.f32 %v2154_v27, %v1907_v29  ;;  %v1909_v53 = vadd.f32 %v4391_v28, %v5625_v14  ;;  %v2163_v50 = vpop.f32.mrf.mxu0 }
 0x2a4   : >> { %v1869_v51 = vpop.f32.mrf.mxu1 }
 0x2a5   : >> { %v5673_v60 = vadd.f32 %v4431_v38, %v1909_v53  ;;  %v1908_v57 = vadd.f32 %v1869_v51, %v5628_v34  ;;  %v4434_v5 = vpop.f32.mrf.mxu0 }
 0x2a6   : >> { %v4394_v2 = vpop.f32.mrf.mxu1 }
 0x2a7   : >> { %v5676_v62 = vadd.f32 %v2163_v50, %v1908_v57  ;;  %v1910_v18 = vadd.f32 %v4394_v2, %v5631_v12  ;;  %v2173_v6 = vpop.f32.mrf.mxu0 }
 0x2a8   : >> { %v1879_v19 = vpop.f32.mrf.mxu1 }
 0x2a9   : >> { %v5679_v17 = vadd.f32 %v4434_v5, %v1910_v18  ;;  %v4437_v20 = vpop.f32.mrf.mxu0 }
 0x2aa   : >> { %v4397_v7 = vpop.f32.mrf.mxu1 }
 0x2ab   : >> { %v2182_v14 = vpop.f32.mrf.mxu0 }
 0x2ac   : >> { %v1888_v24 = vpop.f32.mrf.mxu1 }
 0x2ad   : >> { %v1911_v26 = vadd.f32 %v1888_v24, %v5634_v37  ;;  %v4484_v45 = vpop.f32.mrf.mxu0 }
 0x2ae   : >> { %v4444_v31 = vpop.f32.mrf.mxu1 }
 0x2af   : >> { %v5682_v49 = vadd.f32 %v2182_v14, %v1911_v26  ;;  %v2667_v30 = vpop.f32.mrf.mxu0  ;;  %v2485_v20 = vadd.f32 %v4444_v31, %v5637_v46 }
 0x2b0   : >> { %v2373_v34 = vpop.f32.mrf.mxu1 }
 0x2b1   : >> { %v4487_v56 = vpop.f32.mrf.mxu0  ;;  %v2484_v26 = vadd.f32 %v2373_v34, %v5640_v52 }
 0x2b2   : >> { %v4447_v55 = vpop.f32.mrf.mxu1 }
 0x2b3   : >> { %v2677_v12 = vpop.f32.mrf.mxu0 }
 0x2b4   : >> { %v2383_v59 = vpop.f32.mrf.mxu1 }
 0x2b5   : >> { %v4490_v43 = vpop.f32.mrf.mxu0 }
 0x2b6   : >> { %v4450_v61 = vpop.f32.mrf.mxu1  ;;  %v2486_v43 = vadd.f32 %v4447_v55, %v5643_v11  ;;  %v5854_v11 = vld [vmem:[#allocation3_spill] sm:$0xff] }
 0x2b7   : >> { %v5684_v63 = vpop.f32.mrf.mxu0  ;;  %v2779_v61 = vadd.f32 %v4484_v45, %v2485_v20 }
 0x2b8   : >> { %v2392_v4 = vpop.f32.mrf.mxu1  ;;  %v2780_v46 = vadd.f32 %v4487_v56, %v2486_v43 }
 0x2b9   : >> { %v5686_v35 = vpop.f32.mrf.mxu0  ;;  %v2487_v45 = vadd.f32 %v2392_v4, %v5646_v23 }
 0x2ba   : >> { %v4453_v1 = vpop.f32.mrf.mxu1 }
 0x2bb   : >> { %v5690_v37 = vpop.f32.mrf.mxu0  ;;  %v2489_v56 = vadd.f32 %v4453_v1, %v5649_v47 }
 0x2bc   : >> { %v5688_v3 = vpop.f32.mrf.mxu1 }
 0x2bd   : >> { %v5694_v8 = vpop.f32.mrf.mxu0  ;;  %v2488_v23 = vadd.f32 %v5688_v3, %v5652_v58  ;;  %v2783_v47 = vadd.f32 %v5686_v35, %v2489_v56 }
 0x2be   : >> { %v5692_v10 = vpop.f32.mrf.mxu1 }
 0x2bf   : >> { %v2705_v16 = vpop.f32.mrf.mxu0  ;;  %v2490_v1 = vadd.f32 %v5692_v10, %v5655_v0 }
 0x2c0   : >> { %v2411_v48 = vpop.f32.mrf.mxu1 }
 0x2c1   : >> { %v4499_v54 = vpop.f32.mrf.mxu0 }
 0x2c2   : >> { %v4459_v32 = vpop.f32.mrf.mxu1 }
 0x2c3   : >> { %v5698_v9 = vpop.f32.mrf.mxu0  ;;  %v2778_v32 = vadd.f32 %v2667_v30, %v2484_v26 }
 0x2c4   : >> { %v5696_v36 = vpop.f32.mrf.mxu1 }
 0x2c5   : >> { %v5702_v39 = vpop.f32.mrf.mxu0 }
 0x2c6   : >> { %v5700_v15 = vpop.f32.mrf.mxu1 }
 0x2c7   : >> { %v5706_v25 = vpop.f32.mrf.mxu0 }
 0x2c8   : >> { %v5704_v21 = vpop.f32.mrf.mxu1 }
 0x2c9   : >> { %v5710_v44 = vpop.f32.mrf.mxu0 }
 0x2ca   : >> { %v5708_v42 = vpop.f32.mrf.mxu1 }
 0x2cb   : >> { %v2733_v29 = vpop.f32.mrf.mxu0 }
 0x2cc   : >> { %v2439_v27 = vpop.f32.mrf.mxu1 }
 0x2cd   : >> { %v4508_v38 = vpop.f32.mrf.mxu0 }
 0x2ce   : >> { %v4468_v28 = vpop.f32.mrf.mxu1 }
 0x2cf   : >> { %v5714_v51 = vpop.f32.mrf.mxu0 }
 0x2d0   : >> { %v5712_v53 = vpop.f32.mrf.mxu1 }
 0x2d1   : >> { %v5718_v57 = vpop.f32.mrf.mxu0 }
 0x2d2   : >> { %v5716_v50 = vpop.f32.mrf.mxu1 }
 0x2d3   : >> { %v5722_v5 = vpop.f32.mrf.mxu0 }
 0x2d4   : >> { %v5720_v2 = vpop.f32.mrf.mxu1 }
 0x2d5   : >> { %v5726_v19 = vpop.f32.mrf.mxu0 }
 0x2d6   : >> { %v5724_v18 = vpop.f32.mrf.mxu1 }
 0x2d7   : >> { %v2761_v7 = vpop.f32.mrf.mxu0 }
 0x2d8   : >> { %v2467_v6 = vpop.f32.mrf.mxu1 }
 0x2d9   : >> { %v4517_v14 = vpop.f32.mrf.mxu0 }
 0x2da   : >> { %v4477_v24 = vpop.f32.mrf.mxu1 }
 0x2db   : >> { %v5732_v12 = vpop.f32.mrf.mxu0 }
 0x2dc   : >> { %v5730_v59 = vpop.f32.mrf.mxu1 }
 0x2dd   : >> { %v4564_v16 = vpop.f32.mrf.mxu0 }
 0x2de   : >> { %v4524_v48 = vpop.f32.mrf.mxu1 }
 0x2df   : >> { %v3073_v54 = vadd.f32 %v4524_v48, %v2779_v61  ;;  %v3255_v29 = vpop.f32.mrf.mxu0  ;;  %v2781_v61 = vadd.f32 %v5684_v63, %v2487_v45 }
 0x2e0   : >> { %v2961_v27 = vpop.f32.mrf.mxu1 }
 0x2e1   : >> { %v3367_v31 = vadd.f32 %v4564_v16, %v3073_v54  ;;  %v3072_v28 = vadd.f32 %v2961_v27, %v2778_v32  ;;  %v4567_v34 = vpop.f32.mrf.mxu0  ;;  %v2782_v54 = vadd.f32 %v5690_v37, %v2488_v23 }
 0x2e2   : >> { %v4527_v52 = vpop.f32.mrf.mxu1 }
 0x2e3   : >> { %v3389_v55 = vadd.f32 %v5854_v11, %v3367_v31  ;;  %v3366_v38 = vadd.f32 %v3255_v29, %v3072_v28  ;;  %v3074_v30 = vadd.f32 %v4527_v52, %v2780_v46  ;;  %v3265_v7 = vpop.f32.mrf.mxu0  ;;  %v2784_v46 = vadd.f32 %v5694_v8, %v2490_v1 }
 0x2e4   : >> { %v2971_v6 = vpop.f32.mrf.mxu1  ;;  %v2491_v52 = vadd.f32 %v5696_v36, %v5658_v13  ;;  %v2493_v8 = vadd.f32 %v5700_v15, %v5661_v33  ;;  %v2492_v36 = vadd.f32 %v5704_v21, %v5664_v22  ;;  %v2494_v15 = vadd.f32 %v5708_v42, %v5667_v40 }
 0x2e5   : >> { %3408 = vst.msk [vmem:[%s5737_s19 + $0x8] sm:$0xff] %vm3406_vm3, %v3389_v55  ;;  %v3388_v20 = vadd.f32 %v5854_v11, %v3366_v38  ;;  %v3368_v24 = vadd.f32 %v4567_v34, %v3074_v30  ;;  %v4570_v26 = vpop.f32.mrf.mxu0 }
 0x2e6   : >> { %v4530_v14 = vpop.f32.mrf.mxu1  ;;  %v2785_v13 = vadd.f32 %v5698_v9, %v2491_v52  ;;  %v2787_v33 = vadd.f32 %v5702_v39, %v2493_v8  ;;  %v2786_v23 = vadd.f32 %v5706_v25, %v2492_v36  ;;  %v2499_v8 = vadd.f32 %v5730_v59, %v5682_v49 }
 0x2e7   : >> { %3407 = vst.msk [vmem:[%s5737_s19] sm:$0xff] %vm3406_vm3, %v3388_v20  ;;  %v3390_v4 = vadd.f32 %v5854_v11, %v3368_v24  ;;  %v3274_v48 = vpop.f32.mrf.mxu0 }
 0x2e8   : >> { %v2980_v43 = vpop.f32.mrf.mxu1 }
 0x2e9   : >> { %3409 = vst.msk [vmem:[%s5737_s19 + $0x10] sm:$0xff] %vm3406_vm3, %v3390_v4  ;;  %v3075_v16 = vadd.f32 %v2980_v43, %v2781_v61  ;;  %v4573_v63 = vpop.f32.mrf.mxu0 }
 0x2ea   : >> { %v4533_v32 = vpop.f32.mrf.mxu1 }
 0x2eb   : >> { %v3369_v58 = vadd.f32 %v3274_v48, %v3075_v16  ;;  %v3077_v3 = vadd.f32 %v4533_v32, %v2783_v47  ;;  %v3283_v29 = vpop.f32.mrf.mxu0  ;;  %v2788_v48 = vadd.f32 %v5710_v44, %v2494_v15  ;;  %v2495_v16 = vadd.f32 %v5712_v53, %v5670_v41 }
 0x2ec   : >> { %v2989_v27 = vpop.f32.mrf.mxu1  ;;  %v2497_v44 = vadd.f32 %v5716_v50, %v5673_v60  ;;  %v2496_v53 = vadd.f32 %v5720_v2, %v5676_v62  ;;  %v2498_v50 = vadd.f32 %v5724_v18, %v5679_v17 }
 0x2ed   : >> { %v3391_v35 = vadd.f32 %v5854_v11, %v3369_v58  ;;  %v3371_v31 = vadd.f32 %v4573_v63, %v3077_v3  ;;  %v3076_v28 = vadd.f32 %v2989_v27, %v2782_v54  ;;  %v4576_v10 = vpop.f32.mrf.mxu0  ;;  %v2789_v41 = vadd.f32 %v5714_v51, %v2495_v16 }
 0x2ee   : >> { %v4536_v0 = vpop.f32.mrf.mxu1  ;;  %v2791_v60 = vadd.f32 %v5718_v57, %v2497_v44  ;;  %v2790_v52 = vadd.f32 %v5722_v5, %v2496_v53 }
 0x2ef   : >> { %3410 = vst.msk [vmem:[%s5737_s19 + $0x18] sm:$0xff] %vm3406_vm3, %v3391_v35  ;;  %v3393_v37 = vadd.f32 %v5854_v11, %v3371_v31  ;;  %v3370_v34 = vadd.f32 %v3283_v29, %v3076_v28  ;;  %v3078_v45 = vadd.f32 %v4536_v0, %v2784_v46  ;;  %v3293_v38 = vpop.f32.mrf.mxu0 }
 0x2f0   : >> { %v2999_v55 = vpop.f32.mrf.mxu1 }
 0x2f1   : >> { %3412 = vst.msk [vmem:[%s5737_s19 + $0x28] sm:$0xff] %vm3406_vm3, %v3393_v37  ;;  %v3392_v30 = vadd.f32 %v5854_v11, %v3370_v34  ;;  %v3372_v6 = vadd.f32 %v4576_v10, %v3078_v45  ;;  %v4579_v56 = vpop.f32.mrf.mxu0  ;;  %v2792_v45 = vadd.f32 %v5726_v19, %v2498_v50 }
 0x2f2   : >> { %v4539_v7 = vpop.f32.mrf.mxu1 }
 0x2f3   : >> { %3411 = vst.msk [vmem:[%s5737_s19 + $0x20] sm:$0xff] %vm3406_vm3, %v3392_v30  ;;  %v3394_v20 = vadd.f32 %v5854_v11, %v3372_v6  ;;  %v3302_v14 = vpop.f32.mrf.mxu0 }
 0x2f4   : >> { %v3008_v24 = vpop.f32.mrf.mxu1 }
 0x2f5   : >> { %3413 = vst.msk [vmem:[%s5737_s19 + $0x30] sm:$0xff] %vm3406_vm3, %v3394_v20  ;;  %v3079_v26 = vadd.f32 %v3008_v24, %v2785_v13  ;;  %v4582_v9 = vpop.f32.mrf.mxu0  ;;  %v2793_v24 = vadd.f32 %v5732_v12, %v2499_v8 }
 0x2f6   : >> { %v4542_v61 = vpop.f32.mrf.mxu1 }
 0x2f7   : >> { %v3373_v22 = vadd.f32 %v3302_v14, %v3079_v26  ;;  %v3081_v21 = vadd.f32 %v4542_v61, %v2787_v33  ;;  %v3311_v43 = vpop.f32.mrf.mxu0 }
 0x2f8   : >> { %v3017_v4 = vpop.f32.mrf.mxu1 }
 0x2f9   : >> { %v3395_v39 = vadd.f32 %v5854_v11, %v3373_v22  ;;  %v3375_v47 = vadd.f32 %v4582_v9, %v3081_v21  ;;  %v3080_v1 = vadd.f32 %v3017_v4, %v2786_v23  ;;  %v4585_v42 = vpop.f32.mrf.mxu0 }
 0x2fa   : >> { %v4545_v40 = vpop.f32.mrf.mxu1 }
 0x2fb   : >> { %3414 = vst.msk [vmem:[%s5737_s19 + $0x38] sm:$0xff] %vm3406_vm3, %v3395_v39  ;;  %v3397_v25 = vadd.f32 %v5854_v11, %v3375_v47  ;;  %v3374_v32 = vadd.f32 %v3311_v43, %v3080_v1  ;;  %v3082_v63 = vadd.f32 %v4545_v40, %v2788_v48  ;;  %v3321_v58 = vpop.f32.mrf.mxu0 }
 0x2fc   : >> { %v3027_v54 = vpop.f32.mrf.mxu1 }
 0x2fd   : >> { %3416 = vst.msk [vmem:[%s5737_s19 + $0x48] sm:$0xff] %vm3406_vm3, %v3397_v25  ;;  %v3396_v3 = vadd.f32 %v5854_v11, %v3374_v32  ;;  %v3376_v27 = vadd.f32 %v4585_v42, %v3082_v63  ;;  %v4588_v46 = vpop.f32.mrf.mxu0 }
 0x2fe   : >> { %v4548_v29 = vpop.f32.mrf.mxu1 }
 0x2ff   : >> { %3415 = vst.msk [vmem:[%s5737_s19 + $0x40] sm:$0xff] %vm3406_vm3, %v3396_v3  ;;  %v3398_v35 = vadd.f32 %v5854_v11, %v3376_v27  ;;  %v3330_v28 = vpop.f32.mrf.mxu0 }
 0x300   : >> { %v3036_v31 = vpop.f32.mrf.mxu1 }
 0x301   : >> { %3417 = vst.msk [vmem:[%s5737_s19 + $0x50] sm:$0xff] %vm3406_vm3, %v3398_v35  ;;  %v3083_v0 = vadd.f32 %v3036_v31, %v2789_v41  ;;  %v4591_v51 = vpop.f32.mrf.mxu0 }
 0x302   : >> { %v4551_v10 = vpop.f32.mrf.mxu1 }
 0x303   : >> { %v3377_v62 = vadd.f32 %v3330_v28, %v3083_v0  ;;  %v3085_v2 = vadd.f32 %v4551_v10, %v2791_v60  ;;  %v3339_v34 = vpop.f32.mrf.mxu0 }
 0x304   : >> { %v3045_v37 = vpop.f32.mrf.mxu1 }
 0x305   : >> { %v3399_v57 = vadd.f32 %v5854_v11, %v3377_v62  ;;  %v3379_v55 = vadd.f32 %v4591_v51, %v3085_v2  ;;  %v3084_v38 = vadd.f32 %v3045_v37, %v2790_v52  ;;  %v4594_v18 = vpop.f32.mrf.mxu0 }
 0x306   : >> { %v4554_v17 = vpop.f32.mrf.mxu1 }
 0x307   : >> { %3418 = vst.msk [vmem:[%s5737_s19 + $0x58] sm:$0xff] %vm3406_vm3, %v3399_v57  ;;  %v3401_v5 = vadd.f32 %v5854_v11, %v3379_v55  ;;  %v3378_v30 = vadd.f32 %v3339_v34, %v3084_v38  ;;  %v3086_v6 = vadd.f32 %v4554_v17, %v2792_v45  ;;  %v3349_v19 = vpop.f32.mrf.mxu0 }
 0x308   : >> { %v3055_v7 = vpop.f32.mrf.mxu1 }
 0x309   : >> { %3420 = vst.msk [vmem:[%s5737_s19 + $0x68] sm:$0xff] %vm3406_vm3, %v3401_v5  ;;  %v3400_v56 = vadd.f32 %v5854_v11, %v3378_v30  ;;  %v3380_v13 = vadd.f32 %v4594_v18, %v3086_v6  ;;  %v4597_v20 = vpop.f32.mrf.mxu0 }
 0x30a   : >> { %v4557_v36 = vpop.f32.mrf.mxu1 }
 0x30b   : >> { %3419 = vst.msk [vmem:[%s5737_s19 + $0x60] sm:$0xff] %vm3406_vm3, %v3400_v56  ;;  %v3402_v49 = vadd.f32 %v5854_v11, %v3380_v13  ;;  %v3358_v33 = vpop.f32.mrf.mxu0 }
 0x30c   : >> { %v3064_v59 = vpop.f32.mrf.mxu1 }
 0x30d   : >> { %3421 = vst.msk [vmem:[%s5737_s19 + $0x70] sm:$0xff] %vm3406_vm3, %v3402_v49  ;;  %v3087_v14 = vadd.f32 %v3064_v59, %v2793_v24 }
 0x30f   : >> { %v3381_v15 = vadd.f32 %v3358_v33, %v3087_v14  ;;  %767 = sbr.rel (!%p765_p5) target bundleno = 365 (0x16d), region = 133 }
 0x311   : >> { %v3403_v26 = vadd.f32 %v5854_v11, %v3381_v15 }
 0x313   : >> { %3422 = vst.msk [vmem:[%s5737_s19 + $0x78] sm:$0xff] %vm3406_vm3, %v3403_v26 }
 0x314 PF: > { %s18_s27 = sadd.s32 1, %s4652_s27  }
 0x315   : > { %p15_p6 = scmp.ge.s32.totalorder %s18_s27, 4  }
 0x317   :  { %17 = sbr.rel (!%p15_p6) target bundleno = 1 (0x1), region = 144 }

</bundles_post_ra>
